<compile_context>
chip_gen: v5e
topology: v5e:2x2
jax: 0.10.0
libtpu: 0.0.40
codegen_flags: <defaults>
</compile_context>

<pallas_src>
import math

import jax
import jax.numpy as jnp
from jax.experimental import pallas as pl
from jax.experimental.pallas import tpu as pltpu


def _make_select_kernel(num_rows: int, feat_dim: int):
    """Build kernel computing out[d, t] = table[idx[t], d] via V-way selects."""

    def kernel(idx_ref, table_t_ref, out_ref):
        # idx_ref    : (1,  TN)  int32    token ids along the lane axis
        # table_t_ref: (DP, VP)  float32  zero-padded transposed table (resident)
        # out_ref    : (D,  TN)  float32  lane-dense output block
        idx = idx_ref[...]                       # (1, TN)
        tbl = table_t_ref[...]                   # (DP, VP): one aligned tile
        acc = jnp.zeros(out_ref.shape, dtype=out_ref.dtype)
        for v in range(num_rows):                # static unroll over 21 tokens
            col = tbl[:feat_dim, v:v + 1]        # (D, 1) static slice
            acc = jnp.where(idx == v, col, acc)  # broadcast select -> (D, TN)
        out_ref[...] = acc                       # full, unmasked lane-dense store

    return kernel


def phychem_embedding(x, phychem_table, *, tile_n=None, min_kernel_tokens=4096,
                      channels_first=False):
    """Embedding lookup.

    x             : int array, any shape, token ids in [0, V)
    phychem_table : float (V, D) table
    returns (..., D) float32, or (D, ...) if channels_first=True (skips the
    epilogue transpose HBM pass).
    Out-of-range ids yield all-zero rows instead of raising.
    """
    lead_shape = x.shape
    v, d = phychem_table.shape
    n = math.prod(lead_shape) if lead_shape else 1
    table_f32 = phychem_table.astype(jnp.float32)
    x_i32 = x.astype(jnp.int32)

    # Tiny problems: pallas_call launch / grid-step overhead dominates; the
    # native XLA gather is exact and faster there.
    if n < min_kernel_tokens:
        out = table_f32[x_i32]
        return jnp.moveaxis(out, -1, 0) if channels_first else out

    # ---- tile selection: lane-aligned, >= 4 grid steps where possible ------
    if tile_n is None:
        target_steps = 4  # >= 2 "parallel" steps per TensorCore on v7x (2 TCs)
        tile_n = min(32768, 128 * pl.cdiv(pl.cdiv(n, target_steps), 128))
        tile_n = max(tile_n, 128)
    assert tile_n % 128 == 0, "tile_n must be a multiple of the 128-lane width"
    n_pad = tile_n * pl.cdiv(n, tile_n)

    # ---- lane-dense indices (tail padded with token 0; sliced off below) ---
    idx_flat = x_i32.reshape(-1)
    if n_pad != n:
        idx_flat = jnp.pad(idx_flat, (0, n_pad - n))
    idx_2d = idx_flat.reshape(1, n_pad)

    # ---- transposed table, zero-padded to an (8, 128)-aligned tile ---------
    # (padded rows/cols are never selected, results unchanged)
    dp = 8 * pl.cdiv(d, 8)
    vp = 128 * pl.cdiv(v, 128)
    table_t = jnp.zeros((dp, vp), jnp.float32).at[:d, :v].set(table_f32.T)

    kernel = _make_select_kernel(v, d)

    out_t = pl.pallas_call(
        kernel,
        out_shape=jax.ShapeDtypeStruct((d, n_pad), jnp.float32),
        grid_spec=pltpu.PrefetchScalarGridSpec(
            num_scalar_prefetch=0,
            grid=(n_pad // tile_n,),
            in_specs=[
                pl.BlockSpec((1, tile_n), lambda i: (0, i)),   # token ids
                pl.BlockSpec((dp, vp), lambda i: (0, 0)),      # resident table
            ],
            out_specs=pl.BlockSpec((d, tile_n), lambda i: (0, i)),
        ),
        compiler_params=pltpu.CompilerParams(
            dimension_semantics=("parallel",),
            vmem_limit_bytes=32 * 1024 * 1024,  # v7x-safe; working set ~64 B/token
        ),
    )(idx_2d, table_t)

    out_t = out_t[:, :n]
    if channels_first:
        # Channel-first output: no extra HBM transpose pass.
        return out_t.reshape((d,) + lead_shape)
    # Match the PyTorch module layout (..., D).  This XLA transpose re-reads /
    # re-writes the output once; prefer channels_first=True when the consumer
    # can fuse the layout change.
    return out_t.T.reshape(lead_shape + (d,))


if __name__ == "__main__":
    key = jax.random.PRNGKey(0)
    k_tab, k1, k2, k3 = jax.random.split(key, 4)

    V, D = 21, 7  # 21 amino-acid tokens, 7 physicochemical properties

    # Deterministic synthetic phychem table (stands in for the .npy constants).
    phychem = jax.random.normal(k_tab, (V, D), dtype=jnp.float32)

    # Case 1: kernel path, default tiling (n = 8192 -> tile 2048, 4 grid steps).
    B1, L1 = 8, 1024
    x1 = jax.random.randint(k1, (B1, L1), 0, V, dtype=jnp.int32)
    out1 = jax.block_until_ready(phychem_embedding(x1, phychem))
    ref1 = phychem[x1]
    assert out1.shape == (B1, L1, D)
    assert jnp.allclose(out1, ref1, atol=0.0, rtol=0.0), "kernel path mismatch"

    # Case 1b: channel-first output (skips the epilogue transpose pass).
    out1_cf = jax.block_until_ready(
        phychem_embedding(x1, phychem, channels_first=True))
    assert out1_cf.shape == (D, B1, L1)
    assert jnp.allclose(jnp.moveaxis(out1_cf, 0, -1), ref1, atol=0.0, rtol=0.0), \
        "channel-first path mismatch"

    # Case 2: kernel path with a ragged tail (n = 4500 -> tile 1152, padded).
    B2, L2 = 3, 1500
    x2 = jax.random.randint(k2, (B2, L2), 0, V, dtype=jnp.int32)
    out2 = jax.block_until_ready(phychem_embedding(x2, phychem))
    assert out2.shape == (B2, L2, D)
    assert jnp.allclose(out2, phychem[x2], atol=0.0, rtol=0.0), \
        "padded-tail kernel path mismatch"

    # Case 3: tiny input (original demo shape) -> cheap XLA-gather bypass.
    B3, L3 = 2, 8
    x3 = jax.random.randint(k3, (B3, L3), 0, V, dtype=jnp.int32)
    out3 = jax.block_until_ready(phychem_embedding(x3, phychem))
    assert out3.shape == (B3, L3, D)
    assert jnp.allclose(out3, phychem[x3], atol=0.0, rtol=0.0), "bypass mismatch"

    print("KERNEL_OK")
</pallas_src>

<mosaic_0001>
module attributes {stable_mosaic.version = 11 : i64} {
  func.func @kernel(%arg0: i32, %arg1: memref<1x2048xi32, #tpu.memory_space<vmem>>, %arg2: memref<8x128xf32, #tpu.memory_space<vmem>>, %arg3: memref<7x2048xf32, #tpu.memory_space<vmem>>) attributes {dimension_semantics = [#tpu.dimension_semantics<parallel>], iteration_bounds = array<i64: 4>, scalar_prefetch = 0 : i64, scratch_operands = 0 : i64, tpu.core_type = #tpu.core_type<tc>, window_params = [{transform_indices = @transform_0, window_bounds = array<i64: 1, 2048>}, {pipeline_mode = #tpu.pipeline_mode<synchronous>, transform_indices = @transform_1, window_bounds = array<i64: 8, 128>}, {transform_indices = @transform_2, window_bounds = array<i64: 7, 2048>}]} {
    %c0 = arith.constant 0 : index
    %c0_0 = arith.constant 0 : index
    %0 = vector.load %arg1[%c0, %c0_0] : memref<1x2048xi32, #tpu.memory_space<vmem>>, vector<1x2048xi32>
    %c0_1 = arith.constant 0 : index
    %c0_2 = arith.constant 0 : index
    %1 = vector.load %arg2[%c0_1, %c0_2] : memref<8x128xf32, #tpu.memory_space<vmem>>, vector<8x128xf32>
    %cst = arith.constant 0.000000e+00 : f32
    %2 = vector.broadcast %cst : f32 to vector<7x2048xf32>
    %3 = vector.extract_strided_slice %1 {offsets = [0, 0], sizes = [7, 1], strides = [1, 1]} : vector<8x128xf32> to vector<7x1xf32>
    %c0_i32 = arith.constant 0 : i32
    %4 = vector.broadcast %c0_i32 : i32 to vector<1x2048xi32>
    %5 = arith.cmpi eq, %0, %4 : vector<1x2048xi32>
    %6 = vector.shape_cast %5 : vector<1x2048xi1> to vector<1x2048xi1>
    %7 = vector.broadcast %6 : vector<1x2048xi1> to vector<7x2048xi1>
    %8 = vector.shape_cast %3 : vector<7x1xf32> to vector<7x1xf32>
    %9 = vector.broadcast %8 : vector<7x1xf32> to vector<7x2048xf32>
    %10 = arith.select %7, %9, %2 : vector<7x2048xi1>, vector<7x2048xf32>
    %11 = vector.extract_strided_slice %1 {offsets = [0, 1], sizes = [7, 1], strides = [1, 1]} : vector<8x128xf32> to vector<7x1xf32>
    %c1_i32 = arith.constant 1 : i32
    %12 = vector.broadcast %c1_i32 : i32 to vector<1x2048xi32>
    %13 = arith.cmpi eq, %0, %12 : vector<1x2048xi32>
    %14 = vector.shape_cast %13 : vector<1x2048xi1> to vector<1x2048xi1>
    %15 = vector.broadcast %14 : vector<1x2048xi1> to vector<7x2048xi1>
    %16 = vector.shape_cast %11 : vector<7x1xf32> to vector<7x1xf32>
    %17 = vector.broadcast %16 : vector<7x1xf32> to vector<7x2048xf32>
    %18 = arith.select %15, %17, %10 : vector<7x2048xi1>, vector<7x2048xf32>
    %19 = vector.extract_strided_slice %1 {offsets = [0, 2], sizes = [7, 1], strides = [1, 1]} : vector<8x128xf32> to vector<7x1xf32>
    %c2_i32 = arith.constant 2 : i32
    %20 = vector.broadcast %c2_i32 : i32 to vector<1x2048xi32>
    %21 = arith.cmpi eq, %0, %20 : vector<1x2048xi32>
    %22 = vector.shape_cast %21 : vector<1x2048xi1> to vector<1x2048xi1>
    %23 = vector.broadcast %22 : vector<1x2048xi1> to vector<7x2048xi1>
    %24 = vector.shape_cast %19 : vector<7x1xf32> to vector<7x1xf32>
    %25 = vector.broadcast %24 : vector<7x1xf32> to vector<7x2048xf32>
    %26 = arith.select %23, %25, %18 : vector<7x2048xi1>, vector<7x2048xf32>
    %27 = vector.extract_strided_slice %1 {offsets = [0, 3], sizes = [7, 1], strides = [1, 1]} : vector<8x128xf32> to vector<7x1xf32>
    %c3_i32 = arith.constant 3 : i32
    %28 = vector.broadcast %c3_i32 : i32 to vector<1x2048xi32>
    %29 = arith.cmpi eq, %0, %28 : vector<1x2048xi32>
    %30 = vector.shape_cast %29 : vector<1x2048xi1> to vector<1x2048xi1>
    %31 = vector.broadcast %30 : vector<1x2048xi1> to vector<7x2048xi1>
    %32 = vector.shape_cast %27 : vector<7x1xf32> to vector<7x1xf32>
    %33 = vector.broadcast %32 : vector<7x1xf32> to vector<7x2048xf32>
    %34 = arith.select %31, %33, %26 : vector<7x2048xi1>, vector<7x2048xf32>
    %35 = vector.extract_strided_slice %1 {offsets = [0, 4], sizes = [7, 1], strides = [1, 1]} : vector<8x128xf32> to vector<7x1xf32>
    %c4_i32 = arith.constant 4 : i32
    %36 = vector.broadcast %c4_i32 : i32 to vector<1x2048xi32>
    %37 = arith.cmpi eq, %0, %36 : vector<1x2048xi32>
    %38 = vector.shape_cast %37 : vector<1x2048xi1> to vector<1x2048xi1>
    %39 = vector.broadcast %38 : vector<1x2048xi1> to vector<7x2048xi1>
    %40 = vector.shape_cast %35 : vector<7x1xf32> to vector<7x1xf32>
    %41 = vector.broadcast %40 : vector<7x1xf32> to vector<7x2048xf32>
    %42 = arith.select %39, %41, %34 : vector<7x2048xi1>, vector<7x2048xf32>
    %43 = vector.extract_strided_slice %1 {offsets = [0, 5], sizes = [7, 1], strides = [1, 1]} : vector<8x128xf32> to vector<7x1xf32>
    %c5_i32 = arith.constant 5 : i32
    %44 = vector.broadcast %c5_i32 : i32 to vector<1x2048xi32>
    %45 = arith.cmpi eq, %0, %44 : vector<1x2048xi32>
    %46 = vector.shape_cast %45 : vector<1x2048xi1> to vector<1x2048xi1>
    %47 = vector.broadcast %46 : vector<1x2048xi1> to vector<7x2048xi1>
    %48 = vector.shape_cast %43 : vector<7x1xf32> to vector<7x1xf32>
    %49 = vector.broadcast %48 : vector<7x1xf32> to vector<7x2048xf32>
    %50 = arith.select %47, %49, %42 : vector<7x2048xi1>, vector<7x2048xf32>
    %51 = vector.extract_strided_slice %1 {offsets = [0, 6], sizes = [7, 1], strides = [1, 1]} : vector<8x128xf32> to vector<7x1xf32>
    %c6_i32 = arith.constant 6 : i32
    %52 = vector.broadcast %c6_i32 : i32 to vector<1x2048xi32>
    %53 = arith.cmpi eq, %0, %52 : vector<1x2048xi32>
    %54 = vector.shape_cast %53 : vector<1x2048xi1> to vector<1x2048xi1>
    %55 = vector.broadcast %54 : vector<1x2048xi1> to vector<7x2048xi1>
    %56 = vector.shape_cast %51 : vector<7x1xf32> to vector<7x1xf32>
    %57 = vector.broadcast %56 : vector<7x1xf32> to vector<7x2048xf32>
    %58 = arith.select %55, %57, %50 : vector<7x2048xi1>, vector<7x2048xf32>
    %59 = vector.extract_strided_slice %1 {offsets = [0, 7], sizes = [7, 1], strides = [1, 1]} : vector<8x128xf32> to vector<7x1xf32>
    %c7_i32 = arith.constant 7 : i32
    %60 = vector.broadcast %c7_i32 : i32 to vector<1x2048xi32>
    %61 = arith.cmpi eq, %0, %60 : vector<1x2048xi32>
    %62 = vector.shape_cast %61 : vector<1x2048xi1> to vector<1x2048xi1>
    %63 = vector.broadcast %62 : vector<1x2048xi1> to vector<7x2048xi1>
    %64 = vector.shape_cast %59 : vector<7x1xf32> to vector<7x1xf32>
    %65 = vector.broadcast %64 : vector<7x1xf32> to vector<7x2048xf32>
    %66 = arith.select %63, %65, %58 : vector<7x2048xi1>, vector<7x2048xf32>
    %67 = vector.extract_strided_slice %1 {offsets = [0, 8], sizes = [7, 1], strides = [1, 1]} : vector<8x128xf32> to vector<7x1xf32>
    %c8_i32 = arith.constant 8 : i32
    %68 = vector.broadcast %c8_i32 : i32 to vector<1x2048xi32>
    %69 = arith.cmpi eq, %0, %68 : vector<1x2048xi32>
    %70 = vector.shape_cast %69 : vector<1x2048xi1> to vector<1x2048xi1>
    %71 = vector.broadcast %70 : vector<1x2048xi1> to vector<7x2048xi1>
    %72 = vector.shape_cast %67 : vector<7x1xf32> to vector<7x1xf32>
    %73 = vector.broadcast %72 : vector<7x1xf32> to vector<7x2048xf32>
    %74 = arith.select %71, %73, %66 : vector<7x2048xi1>, vector<7x2048xf32>
    %75 = vector.extract_strided_slice %1 {offsets = [0, 9], sizes = [7, 1], strides = [1, 1]} : vector<8x128xf32> to vector<7x1xf32>
    %c9_i32 = arith.constant 9 : i32
    %76 = vector.broadcast %c9_i32 : i32 to vector<1x2048xi32>
    %77 = arith.cmpi eq, %0, %76 : vector<1x2048xi32>
    %78 = vector.shape_cast %77 : vector<1x2048xi1> to vector<1x2048xi1>
    %79 = vector.broadcast %78 : vector<1x2048xi1> to vector<7x2048xi1>
    %80 = vector.shape_cast %75 : vector<7x1xf32> to vector<7x1xf32>
    %81 = vector.broadcast %80 : vector<7x1xf32> to vector<7x2048xf32>
    %82 = arith.select %79, %81, %74 : vector<7x2048xi1>, vector<7x2048xf32>
    %83 = vector.extract_strided_slice %1 {offsets = [0, 10], sizes = [7, 1], strides = [1, 1]} : vector<8x128xf32> to vector<7x1xf32>
    %c10_i32 = arith.constant 10 : i32
    %84 = vector.broadcast %c10_i32 : i32 to vector<1x2048xi32>
    %85 = arith.cmpi eq, %0, %84 : vector<1x2048xi32>
    %86 = vector.shape_cast %85 : vector<1x2048xi1> to vector<1x2048xi1>
    %87 = vector.broadcast %86 : vector<1x2048xi1> to vector<7x2048xi1>
    %88 = vector.shape_cast %83 : vector<7x1xf32> to vector<7x1xf32>
    %89 = vector.broadcast %88 : vector<7x1xf32> to vector<7x2048xf32>
    %90 = arith.select %87, %89, %82 : vector<7x2048xi1>, vector<7x2048xf32>
    %91 = vector.extract_strided_slice %1 {offsets = [0, 11], sizes = [7, 1], strides = [1, 1]} : vector<8x128xf32> to vector<7x1xf32>
    %c11_i32 = arith.constant 11 : i32
    %92 = vector.broadcast %c11_i32 : i32 to vector<1x2048xi32>
    %93 = arith.cmpi eq, %0, %92 : vector<1x2048xi32>
    %94 = vector.shape_cast %93 : vector<1x2048xi1> to vector<1x2048xi1>
    %95 = vector.broadcast %94 : vector<1x2048xi1> to vector<7x2048xi1>
    %96 = vector.shape_cast %91 : vector<7x1xf32> to vector<7x1xf32>
    %97 = vector.broadcast %96 : vector<7x1xf32> to vector<7x2048xf32>
    %98 = arith.select %95, %97, %90 : vector<7x2048xi1>, vector<7x2048xf32>
    %99 = vector.extract_strided_slice %1 {offsets = [0, 12], sizes = [7, 1], strides = [1, 1]} : vector<8x128xf32> to vector<7x1xf32>
    %c12_i32 = arith.constant 12 : i32
    %100 = vector.broadcast %c12_i32 : i32 to vector<1x2048xi32>
    %101 = arith.cmpi eq, %0, %100 : vector<1x2048xi32>
    %102 = vector.shape_cast %101 : vector<1x2048xi1> to vector<1x2048xi1>
    %103 = vector.broadcast %102 : vector<1x2048xi1> to vector<7x2048xi1>
    %104 = vector.shape_cast %99 : vector<7x1xf32> to vector<7x1xf32>
    %105 = vector.broadcast %104 : vector<7x1xf32> to vector<7x2048xf32>
    %106 = arith.select %103, %105, %98 : vector<7x2048xi1>, vector<7x2048xf32>
    %107 = vector.extract_strided_slice %1 {offsets = [0, 13], sizes = [7, 1], strides = [1, 1]} : vector<8x128xf32> to vector<7x1xf32>
    %c13_i32 = arith.constant 13 : i32
    %108 = vector.broadcast %c13_i32 : i32 to vector<1x2048xi32>
    %109 = arith.cmpi eq, %0, %108 : vector<1x2048xi32>
    %110 = vector.shape_cast %109 : vector<1x2048xi1> to vector<1x2048xi1>
    %111 = vector.broadcast %110 : vector<1x2048xi1> to vector<7x2048xi1>
    %112 = vector.shape_cast %107 : vector<7x1xf32> to vector<7x1xf32>
    %113 = vector.broadcast %112 : vector<7x1xf32> to vector<7x2048xf32>
    %114 = arith.select %111, %113, %106 : vector<7x2048xi1>, vector<7x2048xf32>
    %115 = vector.extract_strided_slice %1 {offsets = [0, 14], sizes = [7, 1], strides = [1, 1]} : vector<8x128xf32> to vector<7x1xf32>
    %c14_i32 = arith.constant 14 : i32
    %116 = vector.broadcast %c14_i32 : i32 to vector<1x2048xi32>
    %117 = arith.cmpi eq, %0, %116 : vector<1x2048xi32>
    %118 = vector.shape_cast %117 : vector<1x2048xi1> to vector<1x2048xi1>
    %119 = vector.broadcast %118 : vector<1x2048xi1> to vector<7x2048xi1>
    %120 = vector.shape_cast %115 : vector<7x1xf32> to vector<7x1xf32>
    %121 = vector.broadcast %120 : vector<7x1xf32> to vector<7x2048xf32>
    %122 = arith.select %119, %121, %114 : vector<7x2048xi1>, vector<7x2048xf32>
    %123 = vector.extract_strided_slice %1 {offsets = [0, 15], sizes = [7, 1], strides = [1, 1]} : vector<8x128xf32> to vector<7x1xf32>
    %c15_i32 = arith.constant 15 : i32
    %124 = vector.broadcast %c15_i32 : i32 to vector<1x2048xi32>
    %125 = arith.cmpi eq, %0, %124 : vector<1x2048xi32>
    %126 = vector.shape_cast %125 : vector<1x2048xi1> to vector<1x2048xi1>
    %127 = vector.broadcast %126 : vector<1x2048xi1> to vector<7x2048xi1>
    %128 = vector.shape_cast %123 : vector<7x1xf32> to vector<7x1xf32>
    %129 = vector.broadcast %128 : vector<7x1xf32> to vector<7x2048xf32>
    %130 = arith.select %127, %129, %122 : vector<7x2048xi1>, vector<7x2048xf32>
    %131 = vector.extract_strided_slice %1 {offsets = [0, 16], sizes = [7, 1], strides = [1, 1]} : vector<8x128xf32> to vector<7x1xf32>
    %c16_i32 = arith.constant 16 : i32
    %132 = vector.broadcast %c16_i32 : i32 to vector<1x2048xi32>
    %133 = arith.cmpi eq, %0, %132 : vector<1x2048xi32>
    %134 = vector.shape_cast %133 : vector<1x2048xi1> to vector<1x2048xi1>
    %135 = vector.broadcast %134 : vector<1x2048xi1> to vector<7x2048xi1>
    %136 = vector.shape_cast %131 : vector<7x1xf32> to vector<7x1xf32>
    %137 = vector.broadcast %136 : vector<7x1xf32> to vector<7x2048xf32>
    %138 = arith.select %135, %137, %130 : vector<7x2048xi1>, vector<7x2048xf32>
    %139 = vector.extract_strided_slice %1 {offsets = [0, 17], sizes = [7, 1], strides = [1, 1]} : vector<8x128xf32> to vector<7x1xf32>
    %c17_i32 = arith.constant 17 : i32
    %140 = vector.broadcast %c17_i32 : i32 to vector<1x2048xi32>
    %141 = arith.cmpi eq, %0, %140 : vector<1x2048xi32>
    %142 = vector.shape_cast %141 : vector<1x2048xi1> to vector<1x2048xi1>
    %143 = vector.broadcast %142 : vector<1x2048xi1> to vector<7x2048xi1>
    %144 = vector.shape_cast %139 : vector<7x1xf32> to vector<7x1xf32>
    %145 = vector.broadcast %144 : vector<7x1xf32> to vector<7x2048xf32>
    %146 = arith.select %143, %145, %138 : vector<7x2048xi1>, vector<7x2048xf32>
    %147 = vector.extract_strided_slice %1 {offsets = [0, 18], sizes = [7, 1], strides = [1, 1]} : vector<8x128xf32> to vector<7x1xf32>
    %c18_i32 = arith.constant 18 : i32
    %148 = vector.broadcast %c18_i32 : i32 to vector<1x2048xi32>
    %149 = arith.cmpi eq, %0, %148 : vector<1x2048xi32>
    %150 = vector.shape_cast %149 : vector<1x2048xi1> to vector<1x2048xi1>
    %151 = vector.broadcast %150 : vector<1x2048xi1> to vector<7x2048xi1>
    %152 = vector.shape_cast %147 : vector<7x1xf32> to vector<7x1xf32>
    %153 = vector.broadcast %152 : vector<7x1xf32> to vector<7x2048xf32>
    %154 = arith.select %151, %153, %146 : vector<7x2048xi1>, vector<7x2048xf32>
    %155 = vector.extract_strided_slice %1 {offsets = [0, 19], sizes = [7, 1], strides = [1, 1]} : vector<8x128xf32> to vector<7x1xf32>
    %c19_i32 = arith.constant 19 : i32
    %156 = vector.broadcast %c19_i32 : i32 to vector<1x2048xi32>
    %157 = arith.cmpi eq, %0, %156 : vector<1x2048xi32>
    %158 = vector.shape_cast %157 : vector<1x2048xi1> to vector<1x2048xi1>
    %159 = vector.broadcast %158 : vector<1x2048xi1> to vector<7x2048xi1>
    %160 = vector.shape_cast %155 : vector<7x1xf32> to vector<7x1xf32>
    %161 = vector.broadcast %160 : vector<7x1xf32> to vector<7x2048xf32>
    %162 = arith.select %159, %161, %154 : vector<7x2048xi1>, vector<7x2048xf32>
    %163 = vector.extract_strided_slice %1 {offsets = [0, 20], sizes = [7, 1], strides = [1, 1]} : vector<8x128xf32> to vector<7x1xf32>
    %c20_i32 = arith.constant 20 : i32
    %164 = vector.broadcast %c20_i32 : i32 to vector<1x2048xi32>
    %165 = arith.cmpi eq, %0, %164 : vector<1x2048xi32>
    %166 = vector.shape_cast %165 : vector<1x2048xi1> to vector<1x2048xi1>
    %167 = vector.broadcast %166 : vector<1x2048xi1> to vector<7x2048xi1>
    %168 = vector.shape_cast %163 : vector<7x1xf32> to vector<7x1xf32>
    %169 = vector.broadcast %168 : vector<7x1xf32> to vector<7x2048xf32>
    %170 = arith.select %167, %169, %162 : vector<7x2048xi1>, vector<7x2048xf32>
    %c0_3 = arith.constant 0 : index
    %c0_4 = arith.constant 0 : index
    %171 = vector.load %arg3[%c0_3, %c0_4] : memref<7x2048xf32, #tpu.memory_space<vmem>>, vector<7x2048xf32>
    tpu.vector_store %arg3[%c0_3, %c0_4], %170 {strides = array<i32>} : memref<7x2048xf32, #tpu.memory_space<vmem>>, vector<7x2048xf32>,
    return
  }
  func.func @transform_0(%arg0: i32) -> (i32, i32) {
    %c0_i32 = arith.constant 0 : i32
    %c0_i32_0 = arith.constant 0 : i32
    return %c0_i32, %arg0 : i32, i32
  }
  func.func @transform_1(%arg0: i32) -> (i32, i32) {
    %c0_i32 = arith.constant 0 : i32
    %c0_i32_0 = arith.constant 0 : i32
    %c0_i32_1 = arith.constant 0 : i32
    return %c0_i32, %c0_i32_0 : i32, i32
  }
  func.func @transform_2(%arg0: i32) -> (i32, i32) {
    %c0_i32 = arith.constant 0 : i32
    %c0_i32_0 = arith.constant 0 : i32
    return %c0_i32, %arg0 : i32, i32
  }
}

</mosaic_0001>

<bundles_post_ra>
// kernel: tpu_custom_call.1
= control target key start
LH: loop header
LB: loop body
LE: loop exit
PB: predicated region body
PF: predicated region fallthrough
CT: control target
= control target key end

     0   :  { %7 = vsyncpa [#allocation3], 0  ;;  %s4942_s0 = inlined_call_operand.hbm [shape: s32[1,8192], index: 0, kind: input, shape index: {}]   ;;  %s4943_s1 = inlined_call_operand.hbm [shape: f32[8,128], index: 1, kind: input, shape index: {}]   ;;  %s4944_s2 = inlined_call_operand.hbm [shape: f32[7,8192], index: 2, kind: output, shape index: {}]  }
   0x1   :  { %9 = vsyncpa [#allocation3 + $0x1], 0 }
   0x2   :  { %10 = vsyncpa [#allocation6], 0 }
   0x3   :  { %11 = vsyncpa [#allocation4], 0 }
   0x4   :  { %13 = vsyncpa [#allocation4 + $0x1], 0  ;;  %s1758_s9 = smov 0   ;;  %s1760_s10 = smov 0  }
   0x5   :  { %s1762_s11 = smov 0   ;;  %s1764_s12 = smov 0  }
   0x6 LB: > { %s1779_s13 = sadd.s32 4294967295, %s1719_s12   ;;  %s1471_s14 = sadd.s32 4294967294, %s1719_s12   ;;  %s1719_s12 = sphi %s1764_s12, %s5741_s12   ;;  %s1715_s11 = sphi %s1762_s11, %s5740_s11   ;;  %s1711_s10 = sphi %s1760_s10, %s5739_s10   ;;  %s1707_s9 = sphi %s1758_s9, %s5738_s9  }
   0x7   : > { %p39_p0 = scmp.ne.s32.totalorder %s1711_s10, %s1707_s9  ;;  %p40_p1 = scmp.eq.s32.totalorder %s1779_s13, 0 }
   0x8   : > { %p84_p2 = scmp.eq.s32.totalorder %s1779_s13, 3  ;;  %p90_p3 = scmp.eq.s32.totalorder %s1471_s14, 3 }
   0x9   : > { %p1788_p4 = por %p40_p1, %p39_p0  ;;  %p1472_p5 = scmp.ge.s32.totalorder %s1719_s12, 1 }
   0xa   : > { %p1793_p6 = por %p90_p3, %p39_p0  ;;  %p97_p7 = scmp.lt.s32.totalorder %s1719_s12, 5 }
   0xb   : > { %s109_s19 = sshll.u32 %s4943_s1, 4  ;;  %s1721_s21 = smov [#allocation5]   ;;  %s110_s19 = int_to_ptr.hbm [resolvable:$true] %s109_s19 }
   0xc   : > { %p1801_p8 = pnand %p1472_p5, %p97_p7  ;;  %s111_s22 = sshll.u32 %s1721_s21, 4  ;;  %s112_s22 = int_to_ptr.vmem [resolvable:$true] %s111_s22 }
   0xd   : > { %s1810_s23 = sadd.s32 1, %s1719_s12   ;;  %s26_s24 = sadd.s32 1, %s1715_s11 }
   0xe   : > { %p1495_p9 = pneg %p1801_p8  ;;  %s23_s25 = ssub.s32 %s1719_s12, %s1810_s23 }
   0xf   : > { %p24_p11 = scmp.eq.s32.totalorder %s23_s25, 0  ;;  %p33_p12 = scmp.ne.s32.totalorder %s1715_s11, %s1711_s10 }
  0x10   : > { %p1496_p10 = pnand %p1495_p9, %p40_p1  ;;  %p34_p13 = scmp.eq.s32.totalorder %s1719_s12, 0 }
  0x11   : > { %s1819_s26 = scalar_select %p24_p11, %s1715_s11, %s26_s24  }
  0x12   : > { %1498 = dma.hbm_to_vmem [thread:$0]  (!%p1496_p10), %s110_s19, 128, %s112_s22, [#allocation6]  }
  0x13   : > { %p1823_p0 = por %p84_p2, %p33_p12  ;;  %p1508_p3 = scmp.lt.s32.totalorder %s1719_s12, 4 }
  0x14   : > { %s122_s28 = sand.u32 1, %s1715_s11   ;;  %s1476_s29 = sshll.u32 %s1719_s12, 4 }
  0x15   : > { %p35_p5 = por %p34_p13, %p33_p12  ;;  %s1475_s30 = sshll.u32 %s122_s28, 4 }
  0x16   : > { %s130_s5 = scalar_lea.hbm %s4942_s0, %s1476_s29  ;;  %s126_s7 = scalar_lea.vmem [#allocation2], %s1475_s30 }
  0x17   : > { %s132_s6 = sshll.u32 %s130_s5, 4  ;;  %s134_s8 = sshll.u32 %s126_s7, 4  ;;  %s133_s6 = int_to_ptr.hbm [resolvable:$true] %s132_s6  ;;  %s135_s8 = int_to_ptr.vmem [resolvable:$true] %s134_s8 }
  0x18   : > { %p1833_p7 = pnand %p1508_p3, %p35_p5  ;;  %s123_s17 = scalar_lea.sflag [#allocation3], %s122_s28 }
  0x19   : > { %s1619_s18 = sshra.s32 %s133_s6, 4  ;;  %s1626_s24 = scalar_lea.hbm %s4942_s0, 64  ;;  %s1620_s18 = int_to_ptr.hbm [resolvable:$true] %s1619_s18 }
  0x1a   : > { %s1621_s19 = scalar_lea.hbm %s1620_s18, 16  ;;  %p1623_p9 = pneg %p1833_p7 }
  0x1b   : > { %p1622_p2 = scmp.ne.s32.totalorder %s1620_s18, %s1621_s19  ;;  %p1627_p12 = scmp.lt.s32.totalorder %s1620_s18, %s4942_s0 }
  0x1c   : > { %p1628_p13 = scmp.lt.s32.totalorder %s1626_s24, %s1621_s19 }
  0x1d   : > { %p1624_p10 = pnand %p1623_p9, %p1622_p2 }
  0x1e   : > { %p1629_p3 = por %p1628_p13, %p1627_p12 }
  0x1f   : > { %p1625_p11 = pneg %p1624_p10 }
  0x21   : > { %p1630_p5 = pnand %p1629_p3, %p1625_p11 }
  0x23   : > { %1633 = shalt.err (!%p1630_p5)
}
  0x24   : > { %1502 = dma.hbm_to_vmem [thread:$0]  (!%p1833_p7), %s133_s6, 256, %s135_s8, %s123_s17  }
  0x25   : > { %143 = sbr.rel (%p1801_p8) target bundleno = 454 (0x1c6), region = 28 }
  0x2a   : > { %s1850_s28 = sand.u32 1, %s1711_s10  }
  0x2b   : > { %s1478_s30 = sshll.u32 %s1850_s28, 4  ;;  %s146_s3 = scalar_lea.sflag [#allocation3], %s1850_s28 }
  0x2c   : > { %s1854_s4 = scalar_lea.vmem [#allocation2], %s1478_s30 }
  0x2d   : > { %1694 = dma.done.wait (%p1788_p4), %s146_s3, 256  }
  0x2e   : > { %1696 = vsyncadd (%p1788_p4), %s146_s3, 4294967040 }
  0x2f   : > { %1698 = dma.done.wait (%p40_p1), [#allocation6], 128  }
  0x30   : > { %1700 = vsyncadd (%p40_p1), [#allocation6], 4294967168  ;;  %v1722_v0 = vmov 2   ;;  %v4945_v1 = vmov 0   ;;  %v1724_v2 = vmov 4   ;;  %v180_v3 = vld [vmem:[#allocation5] sm:$0xff] }
  0x31   : > { %1567 = vset.pattern.permute.xlu1 %v1722_v0  ;;  %1565 = vset.pattern.permute.xlu0 %v4945_v1  ;;  %v1725_v4 = vmov 3   ;;  %v1726_v5 = vmov 1   ;;  %v1727_v6 = vmov 5   ;;  %v1728_v7 = vmov 6   ;;  %v1866_v22 = vld [vmem:[%s1854_s4] sm:$0xff]  ;;  %v1869_v23 = vld [vmem:[%s1854_s4 + $0x8] sm:$0xff] }
  0x32   : > { %1569 = vset.pattern.permute.xlu2 %v1724_v2  ;;  %331 = vperm.xlu1 %1567, %v180_v3   ;;  %v1729_v8 = vmov 8   ;;  %v1730_v9 = vmov 7   ;;  %v1731_v10 = vmov 9   ;;  %v1732_v11 = vmov 13   ;;  %4973 = vst [vmem:[#allocation11_spill] sm:$0xff] %v1866_v22  ;;  %s1480_s15 = sshll.u32 %s1850_s28, 7 }
  0x33   : > { %219 = vperm.xlu0 %1565, %v180_v3   ;;  %443 = vperm.xlu2 %1569, %v180_v3   ;;  %v1733_v12 = vmov 10   ;;  %v1734_v13 = vmov 11   ;;  %v1735_v14 = vmov 18   ;;  %v1736_v15 = vmov 12   ;;  %4974 = vst [vmem:[#allocation12_spill] sm:$0xff] %v1869_v23  ;;  %s4744_s20 = scalar_lea.vmem [#allocation7], %s1480_s15 }
  0x34   : > { %v1737_v16 = vmov 14   ;;  %v1738_v17 = vmov 20   ;;  %v1739_v18 = vmov 15   ;;  %v1740_v19 = vmov 16   ;;  %s1486_s5 = sshll.u32 %s1779_s13, 7  ;;  %s1388_s8 = sshll.u32 %s4744_s20, 4  ;;  %s1389_s8 = int_to_ptr.vmem [resolvable:$true] %s1388_s8 }
  0x35   : > { %v1741_v20 = vmov 17   ;;  %v1742_v21 = vmov 19   ;;  %vm181_vm0 = vcmp.eq.s32.totalorder %v1866_v22, 0  ;;  %vm182_vm1 = vcmp.eq.s32.totalorder %v1869_v23, 0  ;;  %s1386_s7 = scalar_lea.hbm %s4944_s2, %s1486_s5  ;;  %s1375_s17 = scalar_lea.sflag [#allocation4], %s1850_s28 }
  0x36   : > { %v183_v24 = vsel %vm181_vm0, 1, %v4945_v1  ;;  %v184_v25 = vsel %vm182_vm1, 1, %v4945_v1  ;;  %vm238_vm2 = vcmp.eq.s32.totalorder %v1866_v22, 1  ;;  %vm239_vm3 = vcmp.eq.s32.totalorder %v1869_v23, 1  ;;  %s1390_s14 = sshll.u32 %s1386_s7, 4  ;;  %s1669_s24 = scalar_lea.hbm %s4944_s2, 512  ;;  %s1391_s14 = int_to_ptr.hbm [resolvable:$true] %s1390_s14 }
  0x37   : > { %v185_v26 = vperm.slane %v183_v24, 0  ;;  %v186_v27 = vperm.slane %v183_v24, 1  ;;  %v187_v28 = vperm.slane %v183_v24, 2  ;;  %v188_v29 = vperm.slane %v183_v24, 3  ;;  %s1663_s18 = sshra.s32 %s1391_s14, 4  ;;  %s1664_s18 = int_to_ptr.hbm [resolvable:$true] %s1663_s18 }
  0x38   : > { %v189_v30 = vperm.slane %v183_v24, 4  ;;  %v190_v31 = vperm.slane %v183_v24, 5  ;;  %v191_v32 = vperm.slane %v183_v24, 6  ;;  %v192_v33 = vperm.slane %v183_v24, 7  ;;  %s1665_s19 = scalar_lea.hbm %s1664_s18, 128  ;;  %p1670_p7 = scmp.lt.s32.totalorder %s1664_s18, %s4944_s2 }
  0x39   : > { %v1878_v34 = vsel %vm238_vm2, 1, %v4945_v1  ;;  %vm294_vm4 = vcmp.eq.s32.totalorder %v1866_v22, 2  ;;  %vm295_vm5 = vcmp.eq.s32.totalorder %v1869_v23, 2  ;;  %v193_v35 = vperm.slane %v184_v25, 0  ;;  %p1666_p1 = scmp.ne.s32.totalorder %s1664_s18, %s1665_s19  ;;  %p1671_p2 = scmp.lt.s32.totalorder %s1669_s24, %s1665_s19 }
  0x3a   : > { %1568 = vset.pattern.permute.xlu1 %v1725_v4  ;;  %v194_v36 = vperm.slane %v184_v25, 1  ;;  %v195_v37 = vperm.slane %v184_v25, 2  ;;  %v196_v38 = vperm.slane %v184_v25, 3  ;;  %v197_v39 = vperm.slane %v184_v25, 4 }
  0x3b   : > { %1566 = vset.pattern.permute.xlu0 %v1726_v5  ;;  %387 = vperm.xlu1 %1568, %v180_v3   ;;  %v198_v40 = vperm.slane %v184_v25, 5  ;;  %v199_v41 = vperm.slane %v184_v25, 6  ;;  %v1883_v42 = vsel %vm239_vm3, 1, %v4945_v1  ;;  %v200_v43 = vperm.slane %v184_v25, 7  ;;  %p1667_p4 = pnand %p1666_p1, %p1823_p0  ;;  %p1672_p9 = por %p1671_p2, %p1670_p7 }
  0x3c   : > { %275 = vperm.xlu0 %1566, %v180_v3   ;;  %1570 = vset.pattern.permute.xlu2 %v1727_v6  ;;  %v242_v44 = vperm.slane %v1878_v34, 0  ;;  %v1887_v45 = vsel %vm294_vm4, 1, %v4945_v1  ;;  %v1890_v46 = vsel %vm295_vm5, 1, %v4945_v1  ;;  %vm1892_vm6 = vcmp.eq.s32.totalorder %v185_v26, 1 }
  0x3d   : > { %499 = vperm.xlu2 %1570, %v180_v3   ;;  %v243_v48 = vperm.slane %v1878_v34, 1  ;;  %v244_v49 = vperm.slane %v1878_v34, 2  ;;  %v245_v50 = vperm.slane %v1878_v34, 3  ;;  %v246_v51 = vperm.slane %v1878_v34, 4  ;;  %p1668_p8 = pneg %p1667_p4 }
  0x3e   : > { %vm1900_vm7 = vcmp.eq.s32.totalorder %v186_v27, 1  ;;  %vm1904_vm8 = vcmp.eq.s32.totalorder %v187_v28, 1  ;;  %vm1908_vm9 = vcmp.eq.s32.totalorder %v188_v29, 1  ;;  %vm1912_vm10 = vcmp.eq.s32.totalorder %v189_v30, 1 }
  0x3f   : > { %v247_v56 = vperm.slane %v1878_v34, 5  ;;  %v248_v57 = vperm.slane %v1878_v34, 6  ;;  %v249_v58 = vperm.slane %v1878_v34, 7  ;;  %v250_v59 = vperm.slane %v1883_v42, 0  ;;  %p1673_p10 = pnand %p1672_p9, %p1668_p8 }
  0x40   : > { %vm1920_vm11 = vcmp.eq.s32.totalorder %v190_v31, 1  ;;  %vm1924_vm12 = vcmp.eq.s32.totalorder %v191_v32, 1  ;;  %vm1928_vm13 = vcmp.eq.s32.totalorder %v192_v33, 1  ;;  %vm1932_vm14 = vcmp.eq.s32.totalorder %v193_v35, 1 }
  0x41   : > { %v251_v0 = vperm.slane %v1883_v42, 1  ;;  %v252_v2 = vperm.slane %v1883_v42, 2  ;;  %v254_v4 = vperm.slane %v1883_v42, 4  ;;  %vm1940_vm15 = vcmp.eq.s32.totalorder %v194_v36, 1 }
  0x42   : > { %vm1944_vm0 = vcmp.eq.s32.totalorder %v195_v37, 1  ;;  %v4995_v6 = vmov 0  ;;  %vm1948_vm1 = vcmp.eq.s32.totalorder %v196_v38, 1  ;;  %vm1952_vm2 = vcmp.eq.s32.totalorder %v197_v39, 1 }
  0x43   : > { %1571 = vset.pattern.permute.xlu1 %v1728_v7  ;;  %v4996_v6 = vsel %vm1944_vm0, 4294967295, %v4995_v6  ;;  %v4997_v7 = vmov 0  ;;  %vm350_vm3 = vcmp.eq.s32.totalorder %v1866_v22, 3  ;;  %vm1960_vm4 = vcmp.eq.s32.totalorder %v198_v40, 1 }
  0x44   : > { %1573 = vset.pattern.permute.xlu0 %v1729_v8  ;;  %555 = vperm.xlu1 %1571, %v180_v3   ;;  %v4998_v7 = vsel %vm1948_vm1, 4294967295, %v4997_v7  ;;  %v4999_v8 = vmov 0  ;;  %vm1964_vm5 = vcmp.eq.s32.totalorder %v199_v41, 1  ;;  %vm1968_vm1 = vcmp.eq.s32.totalorder %v200_v43, 1 }
  0x45   : > { %667 = vperm.xlu0 %1573, %v180_v3   ;;  %1572 = vset.pattern.permute.xlu2 %v1730_v9  ;;  %v5000_v8 = vsel %vm1952_vm2, 4294967295, %v4999_v8  ;;  %v255_v9 = vperm.slane %v1883_v42, 5  ;;  %v305_v24 = vperm.slane %v1887_v45, 7  ;;  %v1984_v26 = vsel %vm350_vm3, 1, %v4945_v1 }
  0x46   : > { %611 = vperm.xlu2 %1572, %v180_v3   ;;  %v306_v27 = vperm.slane %v1890_v46, 0  ;;  %v307_v28 = vperm.slane %v1890_v46, 1  ;;  %v308_v29 = vperm.slane %v1890_v46, 2  ;;  %v309_v30 = vperm.slane %v1890_v46, 3 }
  0x47   : > { %vm1992_vm2 = vcmp.eq.s32.totalorder %v242_v44, 1  ;;  %v5007_v31 = vmov 0  ;;  %v310_v32 = vperm.slane %v1890_v46, 4  ;;  %v311_v33 = vperm.slane %v1890_v46, 5 }
  0x48   : > { %v5008_v31 = vsel %vm1992_vm2, 4294967295, %v5007_v31  ;;  %v312_v34 = vperm.slane %v1890_v46, 6  ;;  %v313_v35 = vperm.slane %v1890_v46, 7  ;;  %vm2000_vm3 = vcmp.eq.s32.totalorder %v243_v48, 1 }
  0x49   : > { %v5009_v36 = vmov 0  ;;  %v5011_v37 = vmov 0  ;;  %v5013_v38 = vmov 0  ;;  %v5015_v39 = vmov 0 }
  0x4a   : > { %v5010_v36 = vsel %vm2000_vm3, 4294967295, %v5009_v36  ;;  %vm5017_vm2 = vcmp.eq.s32.totalorder %v1869_v23, 3  ;;  %v354_v41 = vperm.slane %v1984_v26, 0  ;;  %vm5018_vm3 = vcmp.eq.s32.totalorder %v1866_v22, 4 }
  0x4b   : > { %v2019_v40 = vsel %vm5017_vm2, 1, %v4945_v1  ;;  %vm2040_vm2 = vcmp.eq.s32.totalorder %v249_v58, 1  ;;  %v5026_v46 = vmov 0  ;;  %vm2044_vm0 = vcmp.eq.s32.totalorder %v250_v59, 1 }
  0x4c   : > { %1574 = vset.pattern.permute.xlu1 %v1731_v10  ;;  %v256_v10 = vperm.slane %v1883_v42, 6  ;;  %v5027_v46 = vsel %vm2040_vm2, 4294967295, %v5026_v46  ;;  %v5028_v48 = vmov 0  ;;  %vm2067_vm2 = vcmp.eq.s32.totalorder %v254_v4, 1 }
  0x4d   : > { %1578 = vset.pattern.permute.xlu0 %v1732_v11  ;;  %723 = vperm.xlu1 %1574, %v180_v3   ;;  %v257_v11 = vperm.slane %v1883_v42, 7  ;;  %v5029_v48 = vsel %vm2044_vm0, 4294967295, %v5028_v48  ;;  %v359_v22 = vperm.slane %v1984_v26, 5  ;;  %v360_v47 = vperm.slane %v1984_v26, 6 }
  0x4e   : > { %947 = vperm.xlu0 %1578, %v180_v3   ;;  %1575 = vset.pattern.permute.xlu2 %v1733_v12  ;;  %v5001_v12 = vmov 0  ;;  %v5050_v60 = vmov 0  ;;  %v5052_v61 = vmov 0  ;;  %v5061_v5 = vmov 0 }
  0x4f   : > { %779 = vperm.xlu2 %1575, %v180_v3   ;;  %v5002_v12 = vsel %vm1960_vm4, 4294967295, %v5001_v12  ;;  %vm2004_vm4 = vcmp.eq.s32.totalorder %v244_v49, 1  ;;  %v355_v49 = vperm.slane %v1984_v26, 1 }
  0x50   : > { %v5012_v37 = vsel %vm2004_vm4, 4294967295, %v5011_v37  ;;  %vm5020_vm4 = vcmp.eq.s32.totalorder %v1869_v23, 4  ;;  %v5036_v23 = vmov 0 }
  0x51   : > { %v2030_v43 = vsel %vm5020_vm4, 1, %v4945_v1  ;;  %vm2055_vm4 = vcmp.eq.s32.totalorder %v251_v0, 1  ;;  %v5037_v23 = vsel %vm2067_vm2, 4294967295, %v5036_v23  ;;  %v361_v0 = vperm.slane %v1984_v26, 7 }
  0x52   : > { %5021 = vst [vmem:[#allocation14_spill] sm:$0xff] %v2030_v43  ;;  %vm2090_vm2 = vcmp.eq.s32.totalorder %v256_v10, 1 }
  0x55   : > { %1576 = vset.pattern.permute.xlu1 %v1734_v13  ;;  %v5003_v13 = vmov 0 }
  0x56   : > { %1583 = vset.pattern.permute.xlu0 %v1735_v14  ;;  %835 = vperm.xlu1 %1576, %v180_v3   ;;  %v5004_v13 = vsel %vm1964_vm5, 4294967295, %v5003_v13  ;;  %v5005_v14 = vmov 0  ;;  %vm2008_vm5 = vcmp.eq.s32.totalorder %v245_v50, 1  ;;  %v356_v50 = vperm.slane %v1984_v26, 2 }
  0x57   : > { %1227 = vperm.xlu0 %1583, %v180_v3   ;;  %1577 = vset.pattern.permute.xlu2 %v1736_v15  ;;  %v5006_v14 = vsel %vm1968_vm1, 4294967295, %v5005_v14  ;;  %v298_v15 = vperm.slane %v1887_v45, 0  ;;  %v5014_v38 = vsel %vm2008_vm5, 4294967295, %v5013_v38  ;;  %vm2012_vm1 = vcmp.eq.s32.totalorder %v246_v51, 1 }
  0x58   : > { %891 = vperm.xlu2 %1577, %v180_v3   ;;  %v5016_v39 = vsel %vm2012_vm1, 4294967295, %v5015_v39  ;;  %vm2032_vm5 = vcmp.eq.s32.totalorder %v247_v56, 1  ;;  %vm2036_vm1 = vcmp.eq.s32.totalorder %v248_v57, 1  ;;  %v357_v51 = vperm.slane %v1984_v26, 3 }
  0x59   : > { %v358_v56 = vperm.slane %v1984_v26, 4 }
  0x5e   : > { %1579 = vset.pattern.permute.xlu1 %v1737_v16  ;;  %v299_v16 = vperm.slane %v1887_v45, 1 }
  0x5f   : > { %1586 = vset.pattern.permute.xlu0 %v1738_v17  ;;  %1003 = vperm.xlu1 %1579, %v180_v3  }
  0x60   : > { %1580 = vset.pattern.permute.xlu2 %v1739_v18  ;;  %v301_v18 = vperm.slane %v1887_v45, 3 }
  0x61   : > { %1059 = vperm.xlu2 %1580, %v180_v3  }
  0x67   : > { %1581 = vset.pattern.permute.xlu1 %v1740_v19  ;;  %v302_v19 = vperm.slane %v1887_v45, 4 }
  0x68   : > { %1115 = vperm.xlu1 %1581, %v180_v3  }
  0x69   : > { %1582 = vset.pattern.permute.xlu2 %v1741_v20  ;;  %v303_v20 = vperm.slane %v1887_v45, 5 }
  0x6a   : > { %1171 = vperm.xlu2 %1582, %v180_v3  }
  0x70   : > { %1584 = vset.pattern.permute.xlu1 %v1742_v21  ;;  %v304_v21 = vperm.slane %v1887_v45, 6 }
  0x71   : > { %1283 = vperm.xlu1 %1584, %v180_v3  }
  0x72   : > { %1585 = vset.pattern.permute.xlu2 %v1738_v17  ;;  %v300_v17 = vperm.slane %v1887_v45, 2 }
  0x73   : > { %1339 = vperm.xlu2 %1585, %v180_v3   ;;  %v253_v3 = vperm.slane %v1883_v42, 3  ;;  %v2025_v42 = vsel %vm5018_vm3, 1, %v4945_v1  ;;  %vm2059_vm3 = vcmp.eq.s32.totalorder %v252_v2, 1 }
  0x74   : > { %5019 = vst [vmem:[#allocation13_spill] sm:$0xff] %v2025_v42 }
  0x75   : > { %vm2063_vm0 = vcmp.eq.s32.totalorder %v253_v3, 1 }
  0xa5   : > { %v1980_v25 = vpop.permute.xlu0 %219 }
  0xa6   : > { %v222_v57 = vsel %vm1892_vm6, %v1980_v25, 0.0  ;;  %v223_v2 = vsel %vm1900_vm7, %v1980_v25, 0.0  ;;  %v224_v3 = vsel %vm1904_vm8, %v1980_v25, 0.0  ;;  %v225_v4 = vsel %vm1908_vm9, %v1980_v25, 0.0 }
  0xa7   : > { %v226_v43 = vsel %vm1912_vm10, %v1980_v25, 0.0  ;;  %vm2086_vm6 = vcmp.eq.s32.totalorder %v255_v9, 1  ;;  %vm2094_vm7 = vcmp.eq.s32.totalorder %v257_v11, 1  ;;  %vm2098_vm8 = vcmp.eq.s32.totalorder %v298_v15, 1 }
  0xa8   : > { %v227_v54 = vsel %vm1920_vm11, %v1980_v25, 0.0  ;;  %v228_v55 = vsel %vm1924_vm12, %v1980_v25, 0.0  ;;  %v229_v9 = vsel %vm1928_vm13, %v1980_v25, 0.0  ;;  %v230_v10 = vsel %vm1932_vm14, %v1980_v25, 0.0 }
  0xa9   : > { %vm2114_vm9 = vcmp.eq.s32.totalorder %v299_v16, 1  ;;  %v5046_v11 = vmov 0  ;;  %vm2118_vm10 = vcmp.eq.s32.totalorder %v300_v17, 1  ;;  %v5048_v15 = vmov 0 }
  0xaa   : > { %v5047_v11 = vsel %vm2114_vm9, 4294967295, %v5046_v11  ;;  %v5049_v15 = vsel %vm2118_vm10, 4294967295, %v5048_v15  ;;  %vm2122_vm11 = vcmp.eq.s32.totalorder %v301_v18, 1  ;;  %vm2126_vm12 = vcmp.eq.s32.totalorder %v302_v19, 1 }
  0xab   : > { %v5051_v60 = vsel %vm2122_vm11, 4294967295, %v5050_v60  ;;  %v5053_v61 = vsel %vm2126_vm12, 4294967295, %v5052_v61  ;;  %v231_v62 = vsel %vm1940_vm15, %v1980_v25, 0.0  ;;  %vm5054_vm13 = vnez %v4996_v6 }
  0xac   : > { %v232_v63 = vsel %vm5054_vm13, %v1980_v25, 0.0  ;;  %vm5055_vm14 = vnez %v4998_v7  ;;  %vm5056_vm10 = vnez %v5000_v8  ;;  %vm2142_vm11 = vcmp.eq.s32.totalorder %v303_v20, 1 }
  0xad   : > { %v233_v16 = vsel %vm5055_vm14, %v1980_v25, 0.0  ;;  %v234_v17 = vsel %vm5056_vm10, %v1980_v25, 0.0  ;;  %v5057_v18 = vmov 0  ;;  %vm2146_vm12 = vcmp.eq.s32.totalorder %v304_v21, 1 }
  0xae   : > { %v5058_v18 = vsel %vm2142_vm11, 4294967295, %v5057_v18  ;;  %v5059_v19 = vmov 0  ;;  %vm2150_vm15 = vcmp.eq.s32.totalorder %v305_v24, 1  ;;  %vm2154_vm13 = vcmp.eq.s32.totalorder %v306_v27, 1 }
  0xaf   : > { %v5060_v19 = vsel %vm2146_vm12, 4294967295, %v5059_v19  ;;  %v5062_v5 = vsel %vm2150_vm15, 4294967295, %v5061_v5  ;;  %v5063_v6 = vmov 0  ;;  %vm5066_vm14 = vnez %v5002_v12 }
  0xb0   : > { %v5064_v6 = vsel %vm2154_vm13, 4294967295, %v5063_v6  ;;  %v235_v7 = vsel %vm5066_vm14, %v1980_v25, 0.0  ;;  %vm5067_vm10 = vnez %v5004_v13  ;;  %vm5068_vm11 = vnez %v5006_v14  ;;  %v276_v14 = vpop.permute.xlu0 %275 }
  0xb1   : > { %5065 = vst [vmem:[#allocation15_spill] sm:$0xff] %v5064_v6  ;;  %v236_v8 = vsel %vm5067_vm10, %v1980_v25, 0.0  ;;  %v237_v20 = vsel %vm5068_vm11, %v1980_v25, 0.0  ;;  %vm2167_vm12 = vcmp.eq.s32.totalorder %v307_v28, 1  ;;  %v5069_v21 = vmov 0 }
  0xb2   : > { %v5070_v21 = vsel %vm2167_vm12, 4294967295, %v5069_v21  ;;  %vm2171_vm15 = vcmp.eq.s32.totalorder %v308_v29, 1  ;;  %v5072_v24 = vmov 0  ;;  %vm2175_vm13 = vcmp.eq.s32.totalorder %v309_v30, 1 }
  0xb3   : > { %5071 = vst [vmem:[#allocation16_spill] sm:$0xff] %v5070_v21  ;;  %v5073_v24 = vsel %vm2171_vm15, 4294967295, %v5072_v24  ;;  %v5075_v27 = vmov 0  ;;  %vm2179_vm14 = vcmp.eq.s32.totalorder %v310_v32, 1  ;;  %v5078_v12 = vmov 0 }
  0xb4   : > { %5074 = vst [vmem:[#allocation17_spill] sm:$0xff] %v5073_v24  ;;  %v5076_v27 = vsel %vm2175_vm13, 4294967295, %v5075_v27  ;;  %v5079_v12 = vsel %vm2179_vm14, 4294967295, %v5078_v12  ;;  %v362_v13 = vperm.slane %v2019_v40, 0  ;;  %vm2184_vm11 = vcmp.eq.s32.totalorder %v311_v33, 1  ;;  %v2200_v33 = vpop.permute.xlu1 %331 }
  0xb5   : > { %5077 = vst [vmem:[#allocation18_spill] sm:$0xff] %v5076_v27  ;;  %v5081_v25 = vmov 0  ;;  %vm2188_vm10 = vcmp.eq.s32.totalorder %v312_v34, 1  ;;  %v5084_v28 = vmov 0  ;;  %vm2192_vm15 = vcmp.eq.s32.totalorder %v313_v35, 1 }
  0xb6   : > { %5080 = vst [vmem:[#allocation19_spill] sm:$0xff] %v5079_v12  ;;  %v5082_v25 = vsel %vm2184_vm11, 4294967295, %v5081_v25  ;;  %v5085_v28 = vsel %vm2188_vm10, 4294967295, %v5084_v28  ;;  %v5087_v29 = vmov 0  ;;  %v363_v30 = vperm.slane %v2019_v40, 1 }
  0xb7   : > { %5083 = vst [vmem:[#allocation20_spill] sm:$0xff] %v5082_v25  ;;  %v5088_v29 = vsel %vm2192_vm15, 4294967295, %v5087_v29  ;;  %v364_v32 = vperm.slane %v2019_v40, 2  ;;  %v365_v12 = vperm.slane %v2019_v40, 3  ;;  %v366_v27 = vperm.slane %v2019_v40, 4 }
  0xb8   : > { %5086 = vst [vmem:[#allocation21_spill] sm:$0xff] %v5085_v28  ;;  %v367_v25 = vperm.slane %v2019_v40, 5  ;;  %v368_v34 = vperm.slane %v2019_v40, 6  ;;  %v369_v28 = vperm.slane %v2019_v40, 7  ;;  %vm2205_vm10 = vcmp.eq.s32.totalorder %v354_v41, 1 }
  0xb9   : > { %5089 = vst [vmem:[#allocation22_spill] sm:$0xff] %v5088_v29  ;;  %v5090_v35 = vmov 0  ;;  %vm2209_vm15 = vcmp.eq.s32.totalorder %v355_v49, 1  ;;  %v5092_v29 = vmov 0  ;;  %vm2213_vm11 = vcmp.eq.s32.totalorder %v356_v50, 1 }
  0xba   : > { %v5091_v35 = vsel %vm2205_vm10, 4294967295, %v5090_v35  ;;  %v5093_v29 = vsel %vm2209_vm15, 4294967295, %v5092_v29  ;;  %v5094_v24 = vmov 0  ;;  %vm2217_vm14 = vcmp.eq.s32.totalorder %v357_v51, 1 }
  0xbb   : > { %v5095_v24 = vsel %vm2213_vm11, 4294967295, %v5094_v24  ;;  %v5096_v21 = vmov 0  ;;  %vm2221_vm13 = vcmp.eq.s32.totalorder %v358_v56, 1  ;;  %v5098_v6 = vmov 0 }
  0xbc   : > { %v5097_v21 = vsel %vm2217_vm14, 4294967295, %v5096_v21  ;;  %v5099_v6 = vsel %vm2221_vm13, 4294967295, %v5098_v6  ;;  %vm5100_vm12 = vnez %v5008_v31  ;;  %vm2227_vm10 = vcmp.eq.s32.totalorder %v359_v22, 1 }
  0xbd   : > { %v278_v40 = vsel %vm5100_vm12, %v276_v14, %v222_v57  ;;  %v5101_v41 = vmov 0  ;;  %vm2231_vm15 = vcmp.eq.s32.totalorder %v360_v47, 1  ;;  %v5103_v49 = vmov 0 }
  0xbe   : > { %v5102_v41 = vsel %vm2227_vm10, 4294967295, %v5101_v41  ;;  %v5104_v49 = vsel %vm2231_vm15, 4294967295, %v5103_v49  ;;  %vm2235_vm11 = vcmp.eq.s32.totalorder %v361_v0, 1  ;;  %v5105_v50 = vmov 0 }
  0xbf   : > { %v5106_v50 = vsel %vm2235_vm11, 4294967295, %v5105_v50  ;;  %vm2239_vm14 = vcmp.eq.s32.totalorder %v362_v13, 1  ;;  %v5107_v51 = vmov 0  ;;  %vm5109_vm13 = vnez %v5010_v36 }
  0xc0   : > { %v5108_v51 = vsel %vm2239_vm14, 4294967295, %v5107_v51  ;;  %v279_v31 = vsel %vm5109_vm13, %v276_v14, %v223_v2  ;;  %vm5110_vm12 = vnez %v5012_v37  ;;  %vm5111_vm10 = vnez %v5014_v38 }
  0xc1   : > { %v280_v22 = vsel %vm5110_vm12, %v276_v14, %v224_v3  ;;  %v281_v56 = vsel %vm5111_vm10, %v276_v14, %v225_v4  ;;  %vm5112_vm9 = vnez %v5016_v39  ;;  %vm2251_vm15 = vcmp.eq.s32.totalorder %v363_v30, 1 }
  0xc2   : > { %v282_v57 = vsel %vm5112_vm9, %v276_v14, %v226_v43  ;;  %vm2255_vm11 = vcmp.eq.s32.totalorder %v364_v32, 1  ;;  %vm2259_vm14 = vcmp.eq.s32.totalorder %v365_v12, 1  ;;  %v283_v37 = vsel %vm2032_vm5, %v276_v14, %v227_v54  ;;  %v5129_v54 = vld [vmem:[#allocation15_spill] sm:$0xff] }
  0xc3   : > { %v284_v38 = vsel %vm2036_vm1, %v276_v14, %v228_v55  ;;  %vm5119_vm9 = vnez %v5027_v46  ;;  %vm5120_vm13 = vnez %v5029_v48  ;;  %v287_v2 = vsel %vm2055_vm4, %v276_v14, %v231_v62  ;;  %v5137_v62 = vld [vmem:[#allocation19_spill] sm:$0xff] }
  0xc4   : > { %v285_v39 = vsel %vm5119_vm9, %v276_v14, %v229_v9  ;;  %v286_v43 = vsel %vm5120_vm13, %v276_v14, %v230_v10  ;;  %v288_v3 = vsel %vm2059_vm3, %v276_v14, %v232_v63  ;;  %v289_v4 = vsel %vm2063_vm0, %v276_v14, %v233_v16  ;;  %v5131_v9 = vld [vmem:[#allocation16_spill] sm:$0xff]  ;;  %v388_v16 = vpop.permute.xlu1 %387 }
  0xc5   : > { %vm5121_vm5 = vnez %v5037_v23  ;;  %v291_v45 = vsel %vm2086_vm6, %v276_v14, %v235_v7  ;;  %v292_v46 = vsel %vm2090_vm2, %v276_v14, %v236_v8  ;;  %v293_v48 = vsel %vm2094_vm7, %v276_v14, %v237_v20  ;;  %v5143_v7 = vld [vmem:[#allocation22_spill] sm:$0xff] }
  0xc6   : > { %v290_v44 = vsel %vm5121_vm5, %v276_v14, %v234_v17  ;;  %v334_v58 = vsel %vm2098_vm8, %v2200_v33, %v278_v40  ;;  %vm5122_vm1 = vnez %v5047_v11  ;;  %vm5123_vm0 = vnez %v5049_v15  ;;  %v5133_v11 = vld [vmem:[#allocation17_spill] sm:$0xff]  ;;  %v5139_v17 = vld [vmem:[#allocation20_spill] sm:$0xff] }
  0xc7   : > { %v335_v1 = vsel %vm5122_vm1, %v2200_v33, %v279_v31  ;;  %v336_v23 = vsel %vm5123_vm0, %v2200_v33, %v280_v22  ;;  %vm5124_vm4 = vnez %v5051_v60  ;;  %vm5125_vm2 = vnez %v5053_v61  ;;  %v5135_v60 = vld [vmem:[#allocation18_spill] sm:$0xff] }
  0xc8   : > { %v337_v42 = vsel %vm5124_vm4, %v2200_v33, %v281_v56  ;;  %v338_v59 = vsel %vm5125_vm2, %v2200_v33, %v282_v57  ;;  %vm5126_vm3 = vnez %v5058_v18  ;;  %vm5127_vm6 = vnez %v5060_v19  ;;  %v5141_v19 = vld [vmem:[#allocation21_spill] sm:$0xff] }
  0xc9   : > { %v339_v26 = vsel %vm5126_vm3, %v2200_v33, %v283_v37  ;;  %v340_v52 = vsel %vm5127_vm6, %v2200_v33, %v284_v38  ;;  %vm5128_vm7 = vnez %v5062_v5  ;;  %vm5130_vm8 = vnez %v5129_v54  ;;  %v5163_v38 = vld [vmem:[#allocation14_spill] sm:$0xff] }
  0xca   : > { %v341_v53 = vsel %vm5128_vm7, %v2200_v33, %v285_v39  ;;  %v342_v55 = vsel %vm5130_vm8, %v2200_v33, %v286_v43  ;;  %vm5132_vm10 = vnez %v5131_v9  ;;  %vm5134_vm12 = vnez %v5133_v11  ;;  %v2481_v11 = vpop.permute.xlu2 %443 }
  0xcb   : > { %v343_v10 = vsel %vm5132_vm10, %v2200_v33, %v287_v2  ;;  %v344_v15 = vsel %vm5134_vm12, %v2200_v33, %v288_v3  ;;  %vm5136_vm9 = vnez %v5135_v60  ;;  %vm5138_vm13 = vnez %v5137_v62  ;;  %v5196_v62 = vld [vmem:[#allocation11_spill] sm:$0xff] }
  0xcc   : > { %v345_v61 = vsel %vm5136_vm9, %v2200_v33, %v289_v4  ;;  %v346_v63 = vsel %vm5138_vm13, %v2200_v33, %v290_v44  ;;  %vm5140_vm5 = vnez %v5139_v17  ;;  %vm5142_vm1 = vnez %v5141_v19 }
  0xcd   : > { %v347_v18 = vsel %vm5140_vm5, %v2200_v33, %v291_v45  ;;  %v348_v5 = vsel %vm5142_vm1, %v2200_v33, %v292_v46  ;;  %vm5144_vm0 = vnez %v5143_v7  ;;  %vm2333_vm4 = vcmp.eq.s32.totalorder %v366_v27, 1 }
  0xce   : > { %v349_v8 = vsel %vm5144_vm0, %v2200_v33, %v293_v48  ;;  %vm2337_vm2 = vcmp.eq.s32.totalorder %v367_v25, 1  ;;  %vm2341_vm3 = vcmp.eq.s32.totalorder %v368_v34, 1  ;;  %vm2345_vm6 = vcmp.eq.s32.totalorder %v369_v28, 1 }
  0xcf   : > { %vm5153_vm7 = vnez %v5091_v35  ;;  %vm5154_vm8 = vnez %v5093_v29  ;;  %vm5155_vm10 = vnez %v5095_v24  ;;  %vm5156_vm12 = vnez %v5097_v21 }
  0xd0   : > { %v2351_v30 = vsel %vm5153_vm7, %v388_v16, %v334_v58  ;;  %v2355_v27 = vsel %vm5154_vm8, %v388_v16, %v335_v1  ;;  %v2359_v25 = vsel %vm5155_vm10, %v388_v16, %v336_v23  ;;  %v2363_v32 = vsel %vm5156_vm12, %v388_v16, %v337_v42 }
  0xd1   : > { %vm5157_vm9 = vnez %v5099_v6  ;;  %vm5158_vm13 = vnez %v5102_v41  ;;  %vm5159_vm5 = vnez %v5104_v49  ;;  %vm5160_vm1 = vnez %v5106_v50 }
  0xd2   : > { %v2367_v28 = vsel %vm5157_vm9, %v388_v16, %v338_v59  ;;  %v2371_v33 = vsel %vm5158_vm13, %v388_v16, %v339_v26  ;;  %v2375_v29 = vsel %vm5159_vm5, %v388_v16, %v340_v52  ;;  %v2379_v24 = vsel %vm5160_vm1, %v388_v16, %v341_v53  ;;  %v500_v58 = vpop.permute.xlu2 %499 }
  0xd3   : > { %vm5161_vm0 = vnez %v5108_v51  ;;  %v2387_v6 = vsel %vm2251_vm15, %v388_v16, %v343_v10  ;;  %v2391_v34 = vsel %vm2255_vm11, %v388_v16, %v344_v15  ;;  %v2395_v35 = vsel %vm2259_vm14, %v388_v16, %v345_v61  ;;  %v5162_v51 = vld [vmem:[#allocation13_spill] sm:$0xff] }
  0xd4   : > { %v2383_v21 = vsel %vm5161_vm0, %v388_v16, %v342_v55  ;;  %v2399_v40 = vsel %vm2333_vm4, %v388_v16, %v346_v63  ;;  %v2403_v41 = vsel %vm2337_vm2, %v388_v16, %v347_v18  ;;  %v2407_v49 = vsel %vm2341_vm3, %v388_v16, %v348_v5 }
  0xd5   : > { %v2411_v50 = vsel %vm2345_vm6, %v388_v16, %v349_v8  ;;  %v410_v31 = vperm.slane %v5162_v51, 0  ;;  %v411_v22 = vperm.slane %v5162_v51, 1  ;;  %v412_v56 = vperm.slane %v5162_v51, 2  ;;  %v5197_v8 = vld [vmem:[#allocation12_spill] sm:$0xff] }
  0xd6   : > { %v413_v57 = vperm.slane %v5162_v51, 3  ;;  %v414_v47 = vperm.slane %v5162_v51, 4  ;;  %v415_v0 = vperm.slane %v5162_v51, 5  ;;  %v416_v36 = vperm.slane %v5162_v51, 6 }
  0xd7   : > { %v417_v37 = vperm.slane %v5162_v51, 7  ;;  %v418_v39 = vperm.slane %v5163_v38, 0  ;;  %v419_v43 = vperm.slane %v5163_v38, 1  ;;  %v420_v2 = vperm.slane %v5163_v38, 2 }
  0xd8   : > { %v421_v3 = vperm.slane %v5163_v38, 3  ;;  %v422_v4 = vperm.slane %v5163_v38, 4  ;;  %v423_v44 = vperm.slane %v5163_v38, 5  ;;  %v424_v45 = vperm.slane %v5163_v38, 6 }
  0xd9   : > { %v425_v46 = vperm.slane %v5163_v38, 7  ;;  %vm2429_vm15 = vcmp.eq.s32.totalorder %v410_v31, 1  ;;  %vm2433_vm14 = vcmp.eq.s32.totalorder %v411_v22, 1  ;;  %vm2437_vm11 = vcmp.eq.s32.totalorder %v412_v56, 1 }
  0xda   : > { %vm2441_vm4 = vcmp.eq.s32.totalorder %v413_v57, 1  ;;  %vm2445_vm2 = vcmp.eq.s32.totalorder %v414_v47, 1  ;;  %vm2449_vm3 = vcmp.eq.s32.totalorder %v415_v0, 1  ;;  %vm2453_vm6 = vcmp.eq.s32.totalorder %v416_v36, 1 }
  0xdb   : > { %vm2457_vm7 = vcmp.eq.s32.totalorder %v417_v37, 1  ;;  %vm2461_vm8 = vcmp.eq.s32.totalorder %v418_v39, 1  ;;  %vm2465_vm10 = vcmp.eq.s32.totalorder %v419_v43, 1  ;;  %vm2469_vm12 = vcmp.eq.s32.totalorder %v420_v2, 1 }
  0xdc   : > { %vm2473_vm9 = vcmp.eq.s32.totalorder %v421_v3, 1  ;;  %v5186_v9 = vmov 0  ;;  %vm2477_vm13 = vcmp.eq.s32.totalorder %v422_v4, 1  ;;  %vm2483_vm5 = vcmp.eq.s32.totalorder %v423_v44, 1 }
  0xdd   : > { %v5187_v9 = vsel %vm2473_vm9, 4294967295, %v5186_v9  ;;  %vm2487_vm1 = vcmp.eq.s32.totalorder %v424_v45, 1  ;;  %vm2491_vm0 = vcmp.eq.s32.totalorder %v425_v46, 1  ;;  %vm462_vm9 = vcmp.eq.s32.totalorder %v5196_v62, 5 }
  0xde   : > { %v446_v63 = vsel %vm2429_vm15, %v2481_v11, %v2351_v30  ;;  %v447_v16 = vsel %vm2433_vm14, %v2481_v11, %v2355_v27  ;;  %v448_v17 = vsel %vm2437_vm11, %v2481_v11, %v2359_v25  ;;  %v449_v18 = vsel %vm2441_vm4, %v2481_v11, %v2363_v32 }
  0xdf   : > { %v450_v19 = vsel %vm2445_vm2, %v2481_v11, %v2367_v28  ;;  %v451_v5 = vsel %vm2449_vm3, %v2481_v11, %v2371_v33  ;;  %v452_v7 = vsel %vm2453_vm6, %v2481_v11, %v2375_v29  ;;  %vm463_vm15 = vcmp.eq.s32.totalorder %v5197_v8, 5 }
  0xe0   : > { %v453_v20 = vsel %vm2457_vm7, %v2481_v11, %v2379_v24  ;;  %v5198_v12 = vmov 0   ;;  %vm518_vm14 = vcmp.eq.s32.totalorder %v5196_v62, 6  ;;  %vm519_vm11 = vcmp.eq.s32.totalorder %v5197_v8, 6 }
  0xe1   : > { %v464_v13 = vsel %vm462_vm9, 1, %v5198_v12  ;;  %v454_v14 = vsel %vm2461_vm8, %v2481_v11, %v2383_v21  ;;  %v455_v30 = vsel %vm2465_vm10, %v2481_v11, %v2387_v6  ;;  %v456_v27 = vsel %vm2469_vm12, %v2481_v11, %v2391_v34 }
  0xe2   : > { %vm5199_vm4 = vnez %v5187_v9  ;;  %v458_v32 = vsel %vm2477_vm13, %v2481_v11, %v2399_v40  ;;  %v459_v28 = vsel %vm2483_vm5, %v2481_v11, %v2403_v41  ;;  %v460_v33 = vsel %vm2487_vm1, %v2481_v11, %v2407_v49 }
  0xe3   : > { %v457_v25 = vsel %vm5199_vm4, %v2481_v11, %v2395_v35  ;;  %v465_v29 = vsel %vm463_vm15, 1, %v5198_v12  ;;  %v461_v24 = vsel %vm2491_vm0, %v2481_v11, %v2411_v50  ;;  %v466_v21 = vperm.slane %v464_v13, 0 }
  0xe4   : > { %v2566_v6 = vsel %vm518_vm14, 1, %v5198_v12  ;;  %v2569_v34 = vsel %vm519_vm11, 1, %v5198_v12  ;;  %v467_v35 = vperm.slane %v464_v13, 1  ;;  %v468_v40 = vperm.slane %v464_v13, 2 }
  0xe5   : > { %v469_v41 = vperm.slane %v464_v13, 3  ;;  %v470_v51 = vperm.slane %v464_v13, 4  ;;  %v471_v31 = vperm.slane %v464_v13, 5  ;;  %v472_v49 = vperm.slane %v464_v13, 6 }
  0xe6   : > { %v473_v22 = vperm.slane %v464_v13, 7  ;;  %v474_v56 = vperm.slane %v465_v29, 0  ;;  %v475_v57 = vperm.slane %v465_v29, 1  ;;  %v476_v47 = vperm.slane %v465_v29, 2 }
  0xe7   : > { %v477_v0 = vperm.slane %v465_v29, 3  ;;  %v478_v36 = vperm.slane %v465_v29, 4  ;;  %v479_v50 = vperm.slane %v465_v29, 5  ;;  %v480_v37 = vperm.slane %v465_v29, 6 }
  0xe8   : > { %v481_v38 = vperm.slane %v465_v29, 7  ;;  %vm2571_vm2 = vcmp.eq.s32.totalorder %v466_v21, 1  ;;  %vm2575_vm3 = vcmp.eq.s32.totalorder %v467_v35, 1  ;;  %vm2579_vm6 = vcmp.eq.s32.totalorder %v468_v40, 1 }
  0xe9   : > { %vm2583_vm7 = vcmp.eq.s32.totalorder %v469_v41, 1  ;;  %vm2587_vm8 = vcmp.eq.s32.totalorder %v470_v51, 1  ;;  %vm2591_vm10 = vcmp.eq.s32.totalorder %v471_v31, 1  ;;  %vm2595_vm12 = vcmp.eq.s32.totalorder %v472_v49, 1 }
  0xea   : > { %vm2599_vm9 = vcmp.eq.s32.totalorder %v473_v22, 1  ;;  %vm2603_vm13 = vcmp.eq.s32.totalorder %v474_v56, 1  ;;  %vm2607_vm5 = vcmp.eq.s32.totalorder %v475_v57, 1  ;;  %vm2611_vm1 = vcmp.eq.s32.totalorder %v476_v47, 1 }
  0xeb   : > { %vm2615_vm0 = vcmp.eq.s32.totalorder %v477_v0, 1  ;;  %vm2619_vm15 = vcmp.eq.s32.totalorder %v478_v36, 1  ;;  %vm2623_vm14 = vcmp.eq.s32.totalorder %v479_v50, 1  ;;  %vm2627_vm11 = vcmp.eq.s32.totalorder %v480_v37, 1 }
  0xec   : > { %vm2631_vm4 = vcmp.eq.s32.totalorder %v481_v38, 1  ;;  %v2637_v54 = vsel %vm2571_vm2, %v500_v58, %v446_v63  ;;  %v2641_v55 = vsel %vm2575_vm3, %v500_v58, %v447_v16  ;;  %v2645_v9 = vsel %vm2579_vm6, %v500_v58, %v448_v17 }
  0xed   : > { %v2649_v10 = vsel %vm2583_vm7, %v500_v58, %v449_v18  ;;  %v2653_v11 = vsel %vm2587_vm8, %v500_v58, %v450_v19  ;;  %v2657_v15 = vsel %vm2591_vm10, %v500_v58, %v451_v5  ;;  %v2661_v60 = vsel %vm2595_vm12, %v500_v58, %v452_v7 }
  0xee   : > { %v2665_v61 = vsel %vm2599_vm9, %v500_v58, %v453_v20  ;;  %v2669_v63 = vsel %vm2603_vm13, %v500_v58, %v454_v14  ;;  %v2673_v16 = vsel %vm2607_vm5, %v500_v58, %v455_v30  ;;  %v2677_v17 = vsel %vm2611_vm1, %v500_v58, %v456_v27 }
  0xef   : > { %v2681_v18 = vsel %vm2615_vm0, %v500_v58, %v457_v25  ;;  %v2685_v19 = vsel %vm2619_vm15, %v500_v58, %v458_v32  ;;  %v2689_v5 = vsel %vm2623_vm14, %v500_v58, %v459_v28  ;;  %v2693_v7 = vsel %vm2627_vm11, %v500_v58, %v460_v33 }
  0xf0   : > { %v2697_v20 = vsel %vm2631_vm4, %v500_v58, %v461_v24  ;;  %v522_v13 = vperm.slane %v2566_v6, 0  ;;  %v523_v14 = vperm.slane %v2566_v6, 1  ;;  %v524_v30 = vperm.slane %v2566_v6, 2 }
  0xf1   : > { %v525_v27 = vperm.slane %v2566_v6, 3  ;;  %v526_v25 = vperm.slane %v2566_v6, 4  ;;  %v527_v32 = vperm.slane %v2566_v6, 5  ;;  %v528_v28 = vperm.slane %v2566_v6, 6 }
  0xf2   : > { %v529_v33 = vperm.slane %v2566_v6, 7  ;;  %v530_v29 = vperm.slane %v2569_v34, 0  ;;  %v531_v24 = vperm.slane %v2569_v34, 1  ;;  %v532_v21 = vperm.slane %v2569_v34, 2 }
  0xf3   : > { %v533_v35 = vperm.slane %v2569_v34, 3  ;;  %v534_v40 = vperm.slane %v2569_v34, 4  ;;  %v535_v41 = vperm.slane %v2569_v34, 5  ;;  %v536_v51 = vperm.slane %v2569_v34, 6 }
  0xf4   : > { %v537_v31 = vperm.slane %v2569_v34, 7  ;;  %vm2715_vm2 = vcmp.eq.s32.totalorder %v522_v13, 1  ;;  %vm2719_vm3 = vcmp.eq.s32.totalorder %v523_v14, 1  ;;  %vm2723_vm6 = vcmp.eq.s32.totalorder %v524_v30, 1  ;;  %v2735_v34 = vpop.permute.xlu1 %555 }
  0xf5   : > { %vm2727_vm7 = vcmp.eq.s32.totalorder %v525_v27, 1  ;;  %vm2731_vm8 = vcmp.eq.s32.totalorder %v526_v25, 1  ;;  %vm2737_vm10 = vcmp.eq.s32.totalorder %v527_v32, 1  ;;  %vm2741_vm12 = vcmp.eq.s32.totalorder %v528_v28, 1 }
  0xf6   : > { %vm2745_vm9 = vcmp.eq.s32.totalorder %v529_v33, 1  ;;  %vm2749_vm13 = vcmp.eq.s32.totalorder %v530_v29, 1  ;;  %vm2753_vm5 = vcmp.eq.s32.totalorder %v531_v24, 1  ;;  %vm2757_vm1 = vcmp.eq.s32.totalorder %v532_v21, 1  ;;  %v612_v24 = vpop.permute.xlu2 %611 }
  0xf7   : > { %v5252_v38 = vmov 0  ;;  %vm2761_vm0 = vcmp.eq.s32.totalorder %v533_v35, 1  ;;  %vm2765_vm15 = vcmp.eq.s32.totalorder %v534_v40, 1  ;;  %vm2769_vm14 = vcmp.eq.s32.totalorder %v535_v41, 1 }
  0xf8   : > { %v5253_v38 = vsel %vm2757_vm1, 4294967295, %v5252_v38  ;;  %vm2773_vm11 = vcmp.eq.s32.totalorder %v536_v51, 1  ;;  %vm2777_vm4 = vcmp.eq.s32.totalorder %v537_v31, 1  ;;  %vm574_vm1 = vcmp.eq.s32.totalorder %v5196_v62, 7 }
  0xf9   : > { %v558_v44 = vsel %vm2715_vm2, %v2735_v34, %v2637_v54  ;;  %v559_v45 = vsel %vm2719_vm3, %v2735_v34, %v2641_v55  ;;  %v560_v46 = vsel %vm2723_vm6, %v2735_v34, %v2645_v9  ;;  %v561_v48 = vsel %vm2727_vm7, %v2735_v34, %v2649_v10 }
  0xfa   : > { %v562_v58 = vsel %vm2731_vm8, %v2735_v34, %v2653_v11  ;;  %v563_v1 = vsel %vm2737_vm10, %v2735_v34, %v2657_v15  ;;  %v564_v23 = vsel %vm2741_vm12, %v2735_v34, %v2661_v60  ;;  %vm575_vm2 = vcmp.eq.s32.totalorder %v5197_v8, 7 }
  0xfb   : > { %v565_v42 = vsel %vm2745_vm9, %v2735_v34, %v2665_v61  ;;  %v576_v59 = vsel %vm574_vm1, 1, %v5198_v12  ;;  %vm630_vm3 = vcmp.eq.s32.totalorder %v5196_v62, 8  ;;  %vm631_vm6 = vcmp.eq.s32.totalorder %v5197_v8, 8 }
  0xfc   : > { %v566_v26 = vsel %vm2749_vm13, %v2735_v34, %v2669_v63  ;;  %v567_v52 = vsel %vm2753_vm5, %v2735_v34, %v2673_v16  ;;  %vm5264_vm7 = vnez %v5253_v38  ;;  %v569_v54 = vsel %vm2761_vm0, %v2735_v34, %v2681_v18 }
  0xfd   : > { %v568_v53 = vsel %vm5264_vm7, %v2735_v34, %v2677_v17  ;;  %v570_v55 = vsel %vm2765_vm15, %v2735_v34, %v2685_v19  ;;  %v571_v9 = vsel %vm2769_vm14, %v2735_v34, %v2689_v5  ;;  %v572_v10 = vsel %vm2773_vm11, %v2735_v34, %v2693_v7 }
  0xfe   : > { %v577_v11 = vsel %vm575_vm2, 1, %v5198_v12  ;;  %v573_v15 = vsel %vm2777_vm4, %v2735_v34, %v2697_v20  ;;  %v578_v60 = vperm.slane %v576_v59, 0  ;;  %v2852_v61 = vsel %vm630_vm3, 1, %v5198_v12 }
  0xff   : > { %v2855_v63 = vsel %vm631_vm6, 1, %v5198_v12  ;;  %v579_v16 = vperm.slane %v576_v59, 1  ;;  %v580_v17 = vperm.slane %v576_v59, 2  ;;  %v581_v18 = vperm.slane %v576_v59, 3 }
 0x100   : > { %v582_v19 = vperm.slane %v576_v59, 4  ;;  %v583_v5 = vperm.slane %v576_v59, 5  ;;  %v584_v7 = vperm.slane %v576_v59, 6  ;;  %v585_v13 = vperm.slane %v576_v59, 7 }
 0x101   : > { %v586_v14 = vperm.slane %v577_v11, 0  ;;  %v587_v30 = vperm.slane %v577_v11, 1  ;;  %v588_v27 = vperm.slane %v577_v11, 2  ;;  %v589_v25 = vperm.slane %v577_v11, 3 }
 0x102   : > { %v590_v32 = vperm.slane %v577_v11, 4  ;;  %v591_v20 = vperm.slane %v577_v11, 5  ;;  %v592_v28 = vperm.slane %v577_v11, 6  ;;  %v593_v33 = vperm.slane %v577_v11, 7 }
 0x103   : > { %vm2857_vm8 = vcmp.eq.s32.totalorder %v578_v60, 1  ;;  %vm2861_vm10 = vcmp.eq.s32.totalorder %v579_v16, 1  ;;  %vm2865_vm12 = vcmp.eq.s32.totalorder %v580_v17, 1  ;;  %vm2869_vm9 = vcmp.eq.s32.totalorder %v581_v18, 1 }
 0x104   : > { %vm2873_vm13 = vcmp.eq.s32.totalorder %v582_v19, 1  ;;  %vm2877_vm5 = vcmp.eq.s32.totalorder %v583_v5, 1  ;;  %vm2881_vm1 = vcmp.eq.s32.totalorder %v584_v7, 1  ;;  %vm2885_vm0 = vcmp.eq.s32.totalorder %v585_v13, 1 }
 0x105   : > { %vm2889_vm15 = vcmp.eq.s32.totalorder %v586_v14, 1  ;;  %vm2893_vm14 = vcmp.eq.s32.totalorder %v587_v30, 1  ;;  %vm2897_vm11 = vcmp.eq.s32.totalorder %v588_v27, 1  ;;  %vm2901_vm4 = vcmp.eq.s32.totalorder %v589_v25, 1 }
 0x106   : > { %vm2905_vm2 = vcmp.eq.s32.totalorder %v590_v32, 1  ;;  %vm2909_vm3 = vcmp.eq.s32.totalorder %v591_v20, 1  ;;  %vm2913_vm6 = vcmp.eq.s32.totalorder %v592_v28, 1  ;;  %vm2917_vm7 = vcmp.eq.s32.totalorder %v593_v33, 1 }
 0x107   : > { %v2923_v50 = vsel %vm2857_vm8, %v612_v24, %v558_v44  ;;  %v2927_v37 = vsel %vm2861_vm10, %v612_v24, %v559_v45  ;;  %v2931_v38 = vsel %vm2865_vm12, %v612_v24, %v560_v46  ;;  %v2935_v39 = vsel %vm2869_vm9, %v612_v24, %v561_v48 }
 0x108   : > { %v2939_v43 = vsel %vm2873_vm13, %v612_v24, %v562_v58  ;;  %v2943_v2 = vsel %vm2877_vm5, %v612_v24, %v563_v1  ;;  %v2947_v3 = vsel %vm2881_vm1, %v612_v24, %v564_v23  ;;  %v2951_v4 = vsel %vm2885_vm0, %v612_v24, %v565_v42 }
 0x109   : > { %v2955_v44 = vsel %vm2889_vm15, %v612_v24, %v566_v26  ;;  %v2959_v45 = vsel %vm2893_vm14, %v612_v24, %v567_v52  ;;  %v2963_v46 = vsel %vm2897_vm11, %v612_v24, %v568_v53  ;;  %v2967_v48 = vsel %vm2901_vm4, %v612_v24, %v569_v54 }
 0x10a   : > { %v2971_v58 = vsel %vm2905_vm2, %v612_v24, %v570_v55  ;;  %v2975_v1 = vsel %vm2909_vm3, %v612_v24, %v571_v9  ;;  %v2979_v23 = vsel %vm2913_vm6, %v612_v24, %v572_v10  ;;  %v2983_v42 = vsel %vm2917_vm7, %v612_v24, %v573_v15 }
 0x10b   : > { %v634_v59 = vperm.slane %v2852_v61, 0  ;;  %v635_v26 = vperm.slane %v2852_v61, 1  ;;  %v636_v52 = vperm.slane %v2852_v61, 2  ;;  %v637_v53 = vperm.slane %v2852_v61, 3 }
 0x10c   : > { %v638_v54 = vperm.slane %v2852_v61, 4  ;;  %v639_v55 = vperm.slane %v2852_v61, 5  ;;  %v640_v9 = vperm.slane %v2852_v61, 6  ;;  %v641_v10 = vperm.slane %v2852_v61, 7  ;;  %v3386_v61 = vld [vmem:[%s1854_s4 + $0x8] sm:$0xff] }
 0x10d   : > { %v642_v11 = vperm.slane %v2855_v63, 0  ;;  %v643_v15 = vperm.slane %v2855_v63, 1  ;;  %v644_v60 = vperm.slane %v2855_v63, 2  ;;  %v645_v16 = vperm.slane %v2855_v63, 3 }
 0x10e   : > { %v646_v17 = vperm.slane %v2855_v63, 4  ;;  %v647_v18 = vperm.slane %v2855_v63, 5  ;;  %v648_v19 = vperm.slane %v2855_v63, 6  ;;  %v649_v5 = vperm.slane %v2855_v63, 7  ;;  %v3021_v63 = vpop.permute.xlu0 %667 }
 0x10f   : > { %vm3001_vm8 = vcmp.eq.s32.totalorder %v634_v59, 1  ;;  %vm3005_vm10 = vcmp.eq.s32.totalorder %v635_v26, 1  ;;  %vm3009_vm12 = vcmp.eq.s32.totalorder %v636_v52, 1  ;;  %vm3013_vm9 = vcmp.eq.s32.totalorder %v637_v53, 1 }
 0x110   : > { %vm3017_vm13 = vcmp.eq.s32.totalorder %v638_v54, 1  ;;  %vm3023_vm5 = vcmp.eq.s32.totalorder %v639_v55, 1  ;;  %vm3027_vm1 = vcmp.eq.s32.totalorder %v640_v9, 1  ;;  %vm3031_vm0 = vcmp.eq.s32.totalorder %v641_v10, 1  ;;  %v724_v10 = vpop.permute.xlu1 %723 }
 0x111   : > { %vm3035_vm15 = vcmp.eq.s32.totalorder %v642_v11, 1  ;;  %vm3039_vm14 = vcmp.eq.s32.totalorder %v643_v15, 1  ;;  %vm3043_vm11 = vcmp.eq.s32.totalorder %v644_v60, 1  ;;  %v5317_v33 = vmov 0  ;;  %v3354_v15 = vld [vmem:[%s1854_s4] sm:$0xff] }
 0x112   : > { %v5318_v33 = vsel %vm3043_vm11, 4294967295, %v5317_v33  ;;  %vm3047_vm4 = vcmp.eq.s32.totalorder %v645_v16, 1  ;;  %vm3051_vm2 = vcmp.eq.s32.totalorder %v646_v17, 1  ;;  %vm3055_vm3 = vcmp.eq.s32.totalorder %v647_v18, 1 }
 0x113   : > { %vm3059_vm6 = vcmp.eq.s32.totalorder %v648_v19, 1  ;;  %vm3063_vm7 = vcmp.eq.s32.totalorder %v649_v5, 1  ;;  %vm686_vm11 = vcmp.eq.s32.totalorder %v5196_v62, 9  ;;  %v670_v41 = vsel %vm3001_vm8, %v3021_v63, %v2923_v50 }
 0x114   : > { %v671_v51 = vsel %vm3005_vm10, %v3021_v63, %v2927_v37  ;;  %v672_v31 = vsel %vm3009_vm12, %v3021_v63, %v2931_v38  ;;  %v673_v49 = vsel %vm3013_vm9, %v3021_v63, %v2935_v39  ;;  %v674_v6 = vsel %vm3017_vm13, %v3021_v63, %v2939_v43 }
 0x115   : > { %v675_v22 = vsel %vm3023_vm5, %v3021_v63, %v2943_v2  ;;  %v676_v56 = vsel %vm3027_vm1, %v3021_v63, %v2947_v3  ;;  %vm687_vm8 = vcmp.eq.s32.totalorder %v5197_v8, 9  ;;  %v677_v57 = vsel %vm3031_vm0, %v3021_v63, %v2951_v4 }
 0x116   : > { %v688_v34 = vsel %vm686_vm11, 1, %v5198_v12  ;;  %vm742_vm10 = vcmp.eq.s32.totalorder %v5196_v62, 10  ;;  %vm743_vm12 = vcmp.eq.s32.totalorder %v5197_v8, 10  ;;  %v678_v47 = vsel %vm3035_vm15, %v3021_v63, %v2955_v44 }
 0x117   : > { %v679_v0 = vsel %vm3039_vm14, %v3021_v63, %v2959_v45  ;;  %vm5329_vm9 = vnez %v5318_v33  ;;  %v681_v62 = vsel %vm3047_vm4, %v3021_v63, %v2967_v48  ;;  %v682_v8 = vsel %vm3051_vm2, %v3021_v63, %v2971_v58 }
 0x118   : > { %v680_v36 = vsel %vm5329_vm9, %v3021_v63, %v2963_v46  ;;  %v683_v50 = vsel %vm3055_vm3, %v3021_v63, %v2975_v1  ;;  %v684_v37 = vsel %vm3059_vm6, %v3021_v63, %v2979_v23  ;;  %v689_v38 = vsel %vm687_vm8, 1, %v5198_v12 }
 0x119   : > { %v685_v39 = vsel %vm3063_vm7, %v3021_v63, %v2983_v42  ;;  %v690_v43 = vperm.slane %v688_v34, 0  ;;  %v3138_v2 = vsel %vm742_vm10, 1, %v5198_v12  ;;  %v3141_v3 = vsel %vm743_vm12, 1, %v5198_v12 }
 0x11a   : > { %v691_v4 = vperm.slane %v688_v34, 1  ;;  %v692_v44 = vperm.slane %v688_v34, 2  ;;  %v693_v45 = vperm.slane %v688_v34, 3  ;;  %v694_v46 = vperm.slane %v688_v34, 4 }
 0x11b   : > { %v695_v48 = vperm.slane %v688_v34, 5  ;;  %v696_v58 = vperm.slane %v688_v34, 6  ;;  %v697_v1 = vperm.slane %v688_v34, 7  ;;  %v698_v23 = vperm.slane %v689_v38, 0 }
 0x11c   : > { %v699_v59 = vperm.slane %v689_v38, 1  ;;  %v700_v26 = vperm.slane %v689_v38, 2  ;;  %v701_v52 = vperm.slane %v689_v38, 3  ;;  %v702_v53 = vperm.slane %v689_v38, 4 }
 0x11d   : > { %v703_v42 = vperm.slane %v689_v38, 5  ;;  %v704_v54 = vperm.slane %v689_v38, 6  ;;  %v705_v55 = vperm.slane %v689_v38, 7  ;;  %vm3143_vm13 = vcmp.eq.s32.totalorder %v690_v43, 1 }
 0x11e   : > { %vm3147_vm5 = vcmp.eq.s32.totalorder %v691_v4, 1  ;;  %vm3151_vm1 = vcmp.eq.s32.totalorder %v692_v44, 1  ;;  %vm3155_vm0 = vcmp.eq.s32.totalorder %v693_v45, 1  ;;  %vm3159_vm15 = vcmp.eq.s32.totalorder %v694_v46, 1 }
 0x11f   : > { %vm3163_vm14 = vcmp.eq.s32.totalorder %v695_v48, 1  ;;  %vm3167_vm11 = vcmp.eq.s32.totalorder %v696_v58, 1  ;;  %vm3171_vm4 = vcmp.eq.s32.totalorder %v697_v1, 1  ;;  %vm3175_vm2 = vcmp.eq.s32.totalorder %v698_v23, 1 }
 0x120   : > { %vm3179_vm3 = vcmp.eq.s32.totalorder %v699_v59, 1  ;;  %vm3183_vm6 = vcmp.eq.s32.totalorder %v700_v26, 1  ;;  %vm3187_vm7 = vcmp.eq.s32.totalorder %v701_v52, 1  ;;  %vm3191_vm8 = vcmp.eq.s32.totalorder %v702_v53, 1 }
 0x121   : > { %vm3195_vm10 = vcmp.eq.s32.totalorder %v703_v42, 1  ;;  %vm3199_vm12 = vcmp.eq.s32.totalorder %v704_v54, 1  ;;  %vm3203_vm9 = vcmp.eq.s32.totalorder %v705_v55, 1  ;;  %v3209_v25 = vsel %vm3143_vm13, %v724_v10, %v670_v41 }
 0x122   : > { %v3213_v32 = vsel %vm3147_vm5, %v724_v10, %v671_v51  ;;  %v3217_v20 = vsel %vm3151_vm1, %v724_v10, %v672_v31  ;;  %v3221_v28 = vsel %vm3155_vm0, %v724_v10, %v673_v49  ;;  %v3225_v33 = vsel %vm3159_vm15, %v724_v10, %v674_v6 }
 0x123   : > { %v3229_v29 = vsel %vm3163_vm14, %v724_v10, %v675_v22  ;;  %v3233_v24 = vsel %vm3167_vm11, %v724_v10, %v676_v56  ;;  %v3237_v21 = vsel %vm3171_vm4, %v724_v10, %v677_v57  ;;  %v3241_v35 = vsel %vm3175_vm2, %v724_v10, %v678_v47 }
 0x124   : > { %v3245_v40 = vsel %vm3179_vm3, %v724_v10, %v679_v0  ;;  %v3249_v41 = vsel %vm3183_vm6, %v724_v10, %v680_v36  ;;  %v3253_v51 = vsel %vm3187_vm7, %v724_v10, %v681_v62  ;;  %v3257_v31 = vsel %vm3191_vm8, %v724_v10, %v682_v8 }
 0x125   : > { %v3261_v49 = vsel %vm3195_vm10, %v724_v10, %v683_v50  ;;  %v3265_v6 = vsel %vm3199_vm12, %v724_v10, %v684_v37  ;;  %v3269_v22 = vsel %vm3203_vm9, %v724_v10, %v685_v39  ;;  %v746_v56 = vperm.slane %v3138_v2, 0 }
 0x126   : > { %v747_v57 = vperm.slane %v3138_v2, 1  ;;  %v748_v34 = vperm.slane %v3138_v2, 2  ;;  %v749_v47 = vperm.slane %v3138_v2, 3  ;;  %v750_v0 = vperm.slane %v3138_v2, 4 }
 0x127   : > { %v751_v36 = vperm.slane %v3138_v2, 5  ;;  %v752_v62 = vperm.slane %v3138_v2, 6  ;;  %v753_v8 = vperm.slane %v3138_v2, 7  ;;  %v754_v50 = vperm.slane %v3141_v3, 0 }
 0x128   : > { %v755_v37 = vperm.slane %v3141_v3, 1  ;;  %v756_v38 = vperm.slane %v3141_v3, 2  ;;  %v757_v39 = vperm.slane %v3141_v3, 3  ;;  %v758_v43 = vperm.slane %v3141_v3, 4 }
 0x129   : > { %v759_v4 = vperm.slane %v3141_v3, 5  ;;  %v760_v44 = vperm.slane %v3141_v3, 6  ;;  %v761_v45 = vperm.slane %v3141_v3, 7  ;;  %vm3287_vm13 = vcmp.eq.s32.totalorder %v746_v56, 1  ;;  %v3307_v3 = vpop.permute.xlu2 %779 }
 0x12a   : > { %vm3291_vm5 = vcmp.eq.s32.totalorder %v747_v57, 1  ;;  %vm3295_vm1 = vcmp.eq.s32.totalorder %v748_v34, 1  ;;  %vm3299_vm0 = vcmp.eq.s32.totalorder %v749_v47, 1  ;;  %vm3303_vm15 = vcmp.eq.s32.totalorder %v750_v0, 1 }
 0x12b   : > { %vm3309_vm14 = vcmp.eq.s32.totalorder %v751_v36, 1  ;;  %vm3313_vm11 = vcmp.eq.s32.totalorder %v752_v62, 1  ;;  %vm3317_vm4 = vcmp.eq.s32.totalorder %v753_v8, 1  ;;  %vm3321_vm2 = vcmp.eq.s32.totalorder %v754_v50, 1 }
 0x12c   : > { %vm3325_vm3 = vcmp.eq.s32.totalorder %v755_v37, 1  ;;  %vm3329_vm6 = vcmp.eq.s32.totalorder %v756_v38, 1  ;;  %vm3333_vm7 = vcmp.eq.s32.totalorder %v757_v39, 1  ;;  %v5384_v54 = vmov 0  ;;  %v836_v37 = vpop.permute.xlu1 %835 }
 0x12d   : > { %v5385_v54 = vsel %vm3333_vm7, 4294967295, %v5384_v54  ;;  %vm3337_vm8 = vcmp.eq.s32.totalorder %v758_v43, 1  ;;  %vm3341_vm10 = vcmp.eq.s32.totalorder %v759_v4, 1  ;;  %vm3345_vm12 = vcmp.eq.s32.totalorder %v760_v44, 1 }
 0x12e   : > { %vm3349_vm9 = vcmp.eq.s32.totalorder %v761_v45, 1  ;;  %vm798_vm7 = vcmp.eq.s32.totalorder %v3354_v15, 11  ;;  %v782_v60 = vsel %vm3287_vm13, %v3307_v3, %v3209_v25  ;;  %v783_v16 = vsel %vm3291_vm5, %v3307_v3, %v3213_v32 }
 0x12f   : > { %v784_v17 = vsel %vm3295_vm1, %v3307_v3, %v3217_v20  ;;  %v785_v18 = vsel %vm3299_vm0, %v3307_v3, %v3221_v28  ;;  %v786_v19 = vsel %vm3303_vm15, %v3307_v3, %v3225_v33  ;;  %v787_v5 = vsel %vm3309_vm14, %v3307_v3, %v3229_v29 }
 0x130   : > { %v788_v7 = vsel %vm3313_vm11, %v3307_v3, %v3233_v24  ;;  %vm799_vm13 = vcmp.eq.s32.totalorder %v3386_v61, 11  ;;  %v789_v13 = vsel %vm3317_vm4, %v3307_v3, %v3237_v21  ;;  %v800_v14 = vsel %vm798_vm7, 1, %v5198_v12 }
 0x131   : > { %vm854_vm5 = vcmp.eq.s32.totalorder %v3354_v15, 12  ;;  %vm855_vm1 = vcmp.eq.s32.totalorder %v3386_v61, 12  ;;  %v790_v30 = vsel %vm3321_vm2, %v3307_v3, %v3241_v35  ;;  %v791_v63 = vsel %vm3325_vm3, %v3307_v3, %v3245_v40 }
 0x132   : > { %v792_v27 = vsel %vm3329_vm6, %v3307_v3, %v3249_v41  ;;  %vm5394_vm0 = vnez %v5385_v54  ;;  %v794_v32 = vsel %vm3337_vm8, %v3307_v3, %v3257_v31  ;;  %v795_v20 = vsel %vm3341_vm10, %v3307_v3, %v3261_v49 }
 0x133   : > { %v793_v25 = vsel %vm5394_vm0, %v3307_v3, %v3253_v51  ;;  %v796_v28 = vsel %vm3345_vm12, %v3307_v3, %v3265_v6  ;;  %v801_v33 = vsel %vm799_vm13, 1, %v5198_v12  ;;  %v797_v29 = vsel %vm3349_vm9, %v3307_v3, %v3269_v22 }
 0x134   : > { %v802_v24 = vperm.slane %v800_v14, 0  ;;  %v3430_v21 = vsel %vm854_vm5, 1, %v5198_v12  ;;  %v3433_v35 = vsel %vm855_vm1, 1, %v5198_v12  ;;  %v803_v40 = vperm.slane %v800_v14, 1 }
 0x135   : > { %v804_v41 = vperm.slane %v800_v14, 2  ;;  %v805_v51 = vperm.slane %v800_v14, 3  ;;  %v806_v31 = vperm.slane %v800_v14, 4  ;;  %v807_v49 = vperm.slane %v800_v14, 5 }
 0x136   : > { %v808_v6 = vperm.slane %v800_v14, 6  ;;  %v809_v56 = vperm.slane %v800_v14, 7  ;;  %v810_v57 = vperm.slane %v801_v33, 0  ;;  %v811_v34 = vperm.slane %v801_v33, 1 }
 0x137   : > { %v812_v47 = vperm.slane %v801_v33, 2  ;;  %v813_v0 = vperm.slane %v801_v33, 3  ;;  %v814_v36 = vperm.slane %v801_v33, 4  ;;  %v815_v22 = vperm.slane %v801_v33, 5 }
 0x138   : > { %v816_v62 = vperm.slane %v801_v33, 6  ;;  %v817_v8 = vperm.slane %v801_v33, 7  ;;  %vm3435_vm15 = vcmp.eq.s32.totalorder %v802_v24, 1  ;;  %vm3439_vm14 = vcmp.eq.s32.totalorder %v803_v40, 1 }
 0x139   : > { %vm3443_vm11 = vcmp.eq.s32.totalorder %v804_v41, 1  ;;  %vm3447_vm4 = vcmp.eq.s32.totalorder %v805_v51, 1  ;;  %vm3451_vm2 = vcmp.eq.s32.totalorder %v806_v31, 1  ;;  %vm3455_vm3 = vcmp.eq.s32.totalorder %v807_v49, 1 }
 0x13a   : > { %vm3459_vm6 = vcmp.eq.s32.totalorder %v808_v6, 1  ;;  %vm3463_vm7 = vcmp.eq.s32.totalorder %v809_v56, 1  ;;  %vm3467_vm8 = vcmp.eq.s32.totalorder %v810_v57, 1  ;;  %vm3471_vm10 = vcmp.eq.s32.totalorder %v811_v34, 1 }
 0x13b   : > { %vm3475_vm12 = vcmp.eq.s32.totalorder %v812_v47, 1  ;;  %vm3479_vm9 = vcmp.eq.s32.totalorder %v813_v0, 1  ;;  %vm3483_vm13 = vcmp.eq.s32.totalorder %v814_v36, 1  ;;  %vm3487_vm5 = vcmp.eq.s32.totalorder %v815_v22, 1 }
 0x13c   : > { %vm3491_vm1 = vcmp.eq.s32.totalorder %v816_v62, 1  ;;  %vm3495_vm0 = vcmp.eq.s32.totalorder %v817_v8, 1  ;;  %v3501_v52 = vsel %vm3435_vm15, %v836_v37, %v782_v60  ;;  %v3505_v53 = vsel %vm3439_vm14, %v836_v37, %v783_v16 }
 0x13d   : > { %v3509_v42 = vsel %vm3443_vm11, %v836_v37, %v784_v17  ;;  %v3513_v54 = vsel %vm3447_vm4, %v836_v37, %v785_v18  ;;  %v3517_v55 = vsel %vm3451_vm2, %v836_v37, %v786_v19  ;;  %v3521_v9 = vsel %vm3455_vm3, %v836_v37, %v787_v5 }
 0x13e   : > { %v3525_v10 = vsel %vm3459_vm6, %v836_v37, %v788_v7  ;;  %v3529_v11 = vsel %vm3463_vm7, %v836_v37, %v789_v13  ;;  %v3533_v60 = vsel %vm3467_vm8, %v836_v37, %v790_v30  ;;  %v3537_v16 = vsel %vm3471_vm10, %v836_v37, %v791_v63 }
 0x13f   : > { %v3541_v17 = vsel %vm3475_vm12, %v836_v37, %v792_v27  ;;  %v3545_v18 = vsel %vm3479_vm9, %v836_v37, %v793_v25  ;;  %v3549_v19 = vsel %vm3483_vm13, %v836_v37, %v794_v32  ;;  %v3553_v5 = vsel %vm3487_vm5, %v836_v37, %v795_v20 }
 0x140   : > { %v3557_v7 = vsel %vm3491_vm1, %v836_v37, %v796_v28  ;;  %v3561_v13 = vsel %vm3495_vm0, %v836_v37, %v797_v29  ;;  %v858_v14 = vperm.slane %v3430_v21, 0  ;;  %v859_v30 = vperm.slane %v3430_v21, 1 }
 0x141   : > { %v860_v63 = vperm.slane %v3430_v21, 2  ;;  %v861_v27 = vperm.slane %v3430_v21, 3  ;;  %v862_v25 = vperm.slane %v3430_v21, 4  ;;  %v863_v32 = vperm.slane %v3430_v21, 5 }
 0x142   : > { %v864_v20 = vperm.slane %v3430_v21, 6  ;;  %v865_v28 = vperm.slane %v3430_v21, 7  ;;  %v866_v33 = vperm.slane %v3433_v35, 0  ;;  %v867_v29 = vperm.slane %v3433_v35, 1 }
 0x143   : > { %v868_v24 = vperm.slane %v3433_v35, 2  ;;  %v869_v40 = vperm.slane %v3433_v35, 3  ;;  %v870_v41 = vperm.slane %v3433_v35, 4  ;;  %v871_v51 = vperm.slane %v3433_v35, 5 }
 0x144   : > { %v872_v31 = vperm.slane %v3433_v35, 6  ;;  %v873_v49 = vperm.slane %v3433_v35, 7  ;;  %vm3579_vm15 = vcmp.eq.s32.totalorder %v858_v14, 1  ;;  %vm3583_vm14 = vcmp.eq.s32.totalorder %v859_v30, 1  ;;  %v3599_v35 = vpop.permute.xlu2 %891 }
 0x145   : > { %vm3587_vm11 = vcmp.eq.s32.totalorder %v860_v63, 1  ;;  %vm3591_vm4 = vcmp.eq.s32.totalorder %v861_v27, 1  ;;  %vm3595_vm2 = vcmp.eq.s32.totalorder %v862_v25, 1  ;;  %vm3601_vm3 = vcmp.eq.s32.totalorder %v863_v32, 1 }
 0x146   : > { %vm3605_vm6 = vcmp.eq.s32.totalorder %v864_v20, 1  ;;  %vm3609_vm7 = vcmp.eq.s32.totalorder %v865_v28, 1  ;;  %vm3613_vm8 = vcmp.eq.s32.totalorder %v866_v33, 1  ;;  %vm3617_vm10 = vcmp.eq.s32.totalorder %v867_v29, 1  ;;  %v948_v29 = vpop.permute.xlu0 %947 }
 0x147   : > { %vm3621_vm12 = vcmp.eq.s32.totalorder %v868_v24, 1  ;;  %v5447_v8 = vmov 0  ;;  %vm3625_vm9 = vcmp.eq.s32.totalorder %v869_v40, 1  ;;  %vm3629_vm13 = vcmp.eq.s32.totalorder %v870_v41, 1 }
 0x148   : > { %v5448_v8 = vsel %vm3621_vm12, 4294967295, %v5447_v8  ;;  %vm3633_vm5 = vcmp.eq.s32.totalorder %v871_v51, 1  ;;  %vm3637_vm1 = vcmp.eq.s32.totalorder %v872_v31, 1  ;;  %vm3641_vm0 = vcmp.eq.s32.totalorder %v873_v49, 1 }
 0x149   : > { %vm910_vm12 = vcmp.eq.s32.totalorder %v3354_v15, 13  ;;  %v894_v4 = vsel %vm3579_vm15, %v3599_v35, %v3501_v52  ;;  %v895_v44 = vsel %vm3583_vm14, %v3599_v35, %v3505_v53  ;;  %v896_v45 = vsel %vm3587_vm11, %v3599_v35, %v3509_v42 }
 0x14a   : > { %v897_v46 = vsel %vm3591_vm4, %v3599_v35, %v3513_v54  ;;  %v898_v2 = vsel %vm3595_vm2, %v3599_v35, %v3517_v55  ;;  %v899_v48 = vsel %vm3601_vm3, %v3599_v35, %v3521_v9  ;;  %v900_v58 = vsel %vm3605_vm6, %v3599_v35, %v3525_v10 }
 0x14b   : > { %vm911_vm15 = vcmp.eq.s32.totalorder %v3386_v61, 13  ;;  %v901_v1 = vsel %vm3609_vm7, %v3599_v35, %v3529_v11  ;;  %v912_v3 = vsel %vm910_vm12, 1, %v5198_v12  ;;  %vm966_vm14 = vcmp.eq.s32.totalorder %v3354_v15, 14 }
 0x14c   : > { %vm967_vm11 = vcmp.eq.s32.totalorder %v3386_v61, 14  ;;  %v902_v23 = vsel %vm3613_vm8, %v3599_v35, %v3533_v60  ;;  %v903_v59 = vsel %vm3617_vm10, %v3599_v35, %v3537_v16  ;;  %vm5459_vm4 = vnez %v5448_v8 }
 0x14d   : > { %v904_v26 = vsel %vm5459_vm4, %v3599_v35, %v3541_v17  ;;  %v905_v52 = vsel %vm3625_vm9, %v3599_v35, %v3545_v18  ;;  %v906_v53 = vsel %vm3629_vm13, %v3599_v35, %v3549_v19  ;;  %v907_v42 = vsel %vm3633_vm5, %v3599_v35, %v3553_v5 }
 0x14e   : > { %v908_v54 = vsel %vm3637_vm1, %v3599_v35, %v3557_v7  ;;  %v913_v55 = vsel %vm911_vm15, 1, %v5198_v12  ;;  %v909_v9 = vsel %vm3641_vm0, %v3599_v35, %v3561_v13  ;;  %v914_v10 = vperm.slane %v912_v3, 0 }
 0x14f   : > { %v3716_v11 = vsel %vm966_vm14, 1, %v5198_v12  ;;  %v3719_v60 = vsel %vm967_vm11, 1, %v5198_v12  ;;  %v915_v16 = vperm.slane %v912_v3, 1  ;;  %v916_v17 = vperm.slane %v912_v3, 2 }
 0x150   : > { %v917_v18 = vperm.slane %v912_v3, 3  ;;  %v918_v19 = vperm.slane %v912_v3, 4  ;;  %v919_v5 = vperm.slane %v912_v3, 5  ;;  %v920_v7 = vperm.slane %v912_v3, 6 }
 0x151   : > { %v921_v14 = vperm.slane %v912_v3, 7  ;;  %v922_v30 = vperm.slane %v913_v55, 0  ;;  %v923_v63 = vperm.slane %v913_v55, 1  ;;  %v924_v27 = vperm.slane %v913_v55, 2 }
 0x152   : > { %v925_v25 = vperm.slane %v913_v55, 3  ;;  %v926_v32 = vperm.slane %v913_v55, 4  ;;  %v927_v13 = vperm.slane %v913_v55, 5  ;;  %v928_v20 = vperm.slane %v913_v55, 6 }
 0x153   : > { %v929_v28 = vperm.slane %v913_v55, 7  ;;  %vm3721_vm2 = vcmp.eq.s32.totalorder %v914_v10, 1  ;;  %vm3725_vm3 = vcmp.eq.s32.totalorder %v915_v16, 1  ;;  %vm3729_vm6 = vcmp.eq.s32.totalorder %v916_v17, 1 }
 0x154   : > { %vm3733_vm7 = vcmp.eq.s32.totalorder %v917_v18, 1  ;;  %vm3737_vm8 = vcmp.eq.s32.totalorder %v918_v19, 1  ;;  %vm3741_vm10 = vcmp.eq.s32.totalorder %v919_v5, 1  ;;  %vm3745_vm12 = vcmp.eq.s32.totalorder %v920_v7, 1 }
 0x155   : > { %vm3749_vm9 = vcmp.eq.s32.totalorder %v921_v14, 1  ;;  %vm3753_vm13 = vcmp.eq.s32.totalorder %v922_v30, 1  ;;  %vm3757_vm5 = vcmp.eq.s32.totalorder %v923_v63, 1  ;;  %vm3761_vm1 = vcmp.eq.s32.totalorder %v924_v27, 1 }
 0x156   : > { %vm3765_vm0 = vcmp.eq.s32.totalorder %v925_v25, 1  ;;  %vm3769_vm15 = vcmp.eq.s32.totalorder %v926_v32, 1  ;;  %vm3773_vm14 = vcmp.eq.s32.totalorder %v927_v13, 1  ;;  %vm3777_vm11 = vcmp.eq.s32.totalorder %v928_v20, 1 }
 0x157   : > { %vm3781_vm4 = vcmp.eq.s32.totalorder %v929_v28, 1  ;;  %v3787_v22 = vsel %vm3721_vm2, %v948_v29, %v894_v4  ;;  %v3791_v62 = vsel %vm3725_vm3, %v948_v29, %v895_v44  ;;  %v3795_v8 = vsel %vm3729_vm6, %v948_v29, %v896_v45 }
 0x158   : > { %v3799_v50 = vsel %vm3733_vm7, %v948_v29, %v897_v46  ;;  %v3803_v37 = vsel %vm3737_vm8, %v948_v29, %v898_v2  ;;  %v3807_v38 = vsel %vm3741_vm10, %v948_v29, %v899_v48  ;;  %v3811_v39 = vsel %vm3745_vm12, %v948_v29, %v900_v58 }
 0x159   : > { %v3815_v43 = vsel %vm3749_vm9, %v948_v29, %v901_v1  ;;  %v3819_v4 = vsel %vm3753_vm13, %v948_v29, %v902_v23  ;;  %v3823_v44 = vsel %vm3757_vm5, %v948_v29, %v903_v59  ;;  %v3827_v45 = vsel %vm3761_vm1, %v948_v29, %v904_v26 }
 0x15a   : > { %v3831_v46 = vsel %vm3765_vm0, %v948_v29, %v905_v52  ;;  %v3835_v2 = vsel %vm3769_vm15, %v948_v29, %v906_v53  ;;  %v3839_v48 = vsel %vm3773_vm14, %v948_v29, %v907_v42  ;;  %v3843_v58 = vsel %vm3777_vm11, %v948_v29, %v908_v54 }
 0x15b   : > { %v3847_v1 = vsel %vm3781_vm4, %v948_v29, %v909_v9  ;;  %v970_v3 = vperm.slane %v3716_v11, 0  ;;  %v971_v23 = vperm.slane %v3716_v11, 1  ;;  %v972_v59 = vperm.slane %v3716_v11, 2 }
 0x15c   : > { %v973_v26 = vperm.slane %v3716_v11, 3  ;;  %v974_v52 = vperm.slane %v3716_v11, 4  ;;  %v975_v53 = vperm.slane %v3716_v11, 5  ;;  %v976_v42 = vperm.slane %v3716_v11, 6 }
 0x15d   : > { %v977_v54 = vperm.slane %v3716_v11, 7  ;;  %v978_v55 = vperm.slane %v3719_v60, 0  ;;  %v979_v9 = vperm.slane %v3719_v60, 1  ;;  %v980_v10 = vperm.slane %v3719_v60, 2 }
 0x15e   : > { %v981_v16 = vperm.slane %v3719_v60, 3  ;;  %v982_v17 = vperm.slane %v3719_v60, 4  ;;  %v983_v18 = vperm.slane %v3719_v60, 5  ;;  %v984_v19 = vperm.slane %v3719_v60, 6 }
 0x15f   : > { %v985_v5 = vperm.slane %v3719_v60, 7  ;;  %vm3865_vm2 = vcmp.eq.s32.totalorder %v970_v3, 1  ;;  %vm3869_vm3 = vcmp.eq.s32.totalorder %v971_v23, 1  ;;  %vm3873_vm6 = vcmp.eq.s32.totalorder %v972_v59, 1  ;;  %v3885_v60 = vpop.permute.xlu1 %1003 }
 0x160   : > { %vm3877_vm7 = vcmp.eq.s32.totalorder %v973_v26, 1  ;;  %vm3881_vm8 = vcmp.eq.s32.totalorder %v974_v52, 1  ;;  %vm3887_vm10 = vcmp.eq.s32.totalorder %v975_v53, 1  ;;  %vm3891_vm12 = vcmp.eq.s32.totalorder %v976_v42, 1 }
 0x161   : > { %vm3895_vm9 = vcmp.eq.s32.totalorder %v977_v54, 1  ;;  %vm3899_vm13 = vcmp.eq.s32.totalorder %v978_v55, 1  ;;  %vm3903_vm5 = vcmp.eq.s32.totalorder %v979_v9, 1  ;;  %vm3907_vm1 = vcmp.eq.s32.totalorder %v980_v10, 1  ;;  %v1060_v9 = vpop.permute.xlu2 %1059 }
 0x162   : > { %v5512_v28 = vmov 0  ;;  %vm3911_vm0 = vcmp.eq.s32.totalorder %v981_v16, 1  ;;  %vm3915_vm15 = vcmp.eq.s32.totalorder %v982_v17, 1  ;;  %vm3919_vm14 = vcmp.eq.s32.totalorder %v983_v18, 1 }
 0x163   : > { %v5513_v28 = vsel %vm3907_vm1, 4294967295, %v5512_v28  ;;  %vm3923_vm11 = vcmp.eq.s32.totalorder %v984_v19, 1  ;;  %vm3927_vm4 = vcmp.eq.s32.totalorder %v985_v5, 1  ;;  %vm1022_vm1 = vcmp.eq.s32.totalorder %v3354_v15, 15 }
 0x164   : > { %v1006_v51 = vsel %vm3865_vm2, %v3885_v60, %v3787_v22  ;;  %v1007_v31 = vsel %vm3869_vm3, %v3885_v60, %v3791_v62  ;;  %v1008_v49 = vsel %vm3873_vm6, %v3885_v60, %v3795_v8  ;;  %v1009_v6 = vsel %vm3877_vm7, %v3885_v60, %v3799_v50 }
 0x165   : > { %v1010_v21 = vsel %vm3881_vm8, %v3885_v60, %v3803_v37  ;;  %v1011_v56 = vsel %vm3887_vm10, %v3885_v60, %v3807_v38  ;;  %v1012_v57 = vsel %vm3891_vm12, %v3885_v60, %v3811_v39  ;;  %vm1023_vm2 = vcmp.eq.s32.totalorder %v3386_v61, 15 }
 0x166   : > { %v1013_v34 = vsel %vm3895_vm9, %v3885_v60, %v3815_v43  ;;  %v1024_v35 = vsel %vm1022_vm1, 1, %v5198_v12  ;;  %vm1078_vm3 = vcmp.eq.s32.totalorder %v3354_v15, 16  ;;  %vm1079_vm6 = vcmp.eq.s32.totalorder %v3386_v61, 16 }
 0x167   : > { %v1014_v47 = vsel %vm3899_vm13, %v3885_v60, %v3819_v4  ;;  %v1015_v0 = vsel %vm3903_vm5, %v3885_v60, %v3823_v44  ;;  %vm5524_vm7 = vnez %v5513_v28  ;;  %v1017_v22 = vsel %vm3911_vm0, %v3885_v60, %v3831_v46 }
 0x168   : > { %v1016_v36 = vsel %vm5524_vm7, %v3885_v60, %v3827_v45  ;;  %v1018_v62 = vsel %vm3915_vm15, %v3885_v60, %v3835_v2  ;;  %v1019_v8 = vsel %vm3919_vm14, %v3885_v60, %v3839_v48  ;;  %v1020_v50 = vsel %vm3923_vm11, %v3885_v60, %v3843_v58 }
 0x169   : > { %v1025_v37 = vsel %vm1023_vm2, 1, %v5198_v12  ;;  %v1021_v38 = vsel %vm3927_vm4, %v3885_v60, %v3847_v1  ;;  %v1026_v39 = vperm.slane %v1024_v35, 0  ;;  %v4002_v43 = vsel %vm1078_vm3, 1, %v5198_v12 }
 0x16a   : > { %v4005_v4 = vsel %vm1079_vm6, 1, %v5198_v12  ;;  %v1027_v44 = vperm.slane %v1024_v35, 1  ;;  %v1028_v45 = vperm.slane %v1024_v35, 2  ;;  %v1029_v46 = vperm.slane %v1024_v35, 3 }
 0x16b   : > { %v1030_v2 = vperm.slane %v1024_v35, 4  ;;  %v1031_v48 = vperm.slane %v1024_v35, 5  ;;  %v1032_v58 = vperm.slane %v1024_v35, 6  ;;  %v1033_v3 = vperm.slane %v1024_v35, 7 }
 0x16c   : > { %v1034_v23 = vperm.slane %v1025_v37, 0  ;;  %v1035_v59 = vperm.slane %v1025_v37, 1  ;;  %v1036_v26 = vperm.slane %v1025_v37, 2  ;;  %v1037_v52 = vperm.slane %v1025_v37, 3 }
 0x16d   : > { %v1038_v53 = vperm.slane %v1025_v37, 4  ;;  %v1039_v1 = vperm.slane %v1025_v37, 5  ;;  %v1040_v42 = vperm.slane %v1025_v37, 6  ;;  %v1041_v54 = vperm.slane %v1025_v37, 7 }
 0x16e   : > { %vm4007_vm8 = vcmp.eq.s32.totalorder %v1026_v39, 1  ;;  %vm4011_vm10 = vcmp.eq.s32.totalorder %v1027_v44, 1  ;;  %vm4015_vm12 = vcmp.eq.s32.totalorder %v1028_v45, 1  ;;  %vm4019_vm9 = vcmp.eq.s32.totalorder %v1029_v46, 1 }
 0x16f   : > { %vm4023_vm13 = vcmp.eq.s32.totalorder %v1030_v2, 1  ;;  %vm4027_vm5 = vcmp.eq.s32.totalorder %v1031_v48, 1  ;;  %vm4031_vm1 = vcmp.eq.s32.totalorder %v1032_v58, 1  ;;  %vm4035_vm0 = vcmp.eq.s32.totalorder %v1033_v3, 1 }
 0x170   : > { %vm4039_vm15 = vcmp.eq.s32.totalorder %v1034_v23, 1  ;;  %vm4043_vm14 = vcmp.eq.s32.totalorder %v1035_v59, 1  ;;  %vm4047_vm11 = vcmp.eq.s32.totalorder %v1036_v26, 1  ;;  %vm4051_vm4 = vcmp.eq.s32.totalorder %v1037_v52, 1 }
 0x171   : > { %vm4055_vm2 = vcmp.eq.s32.totalorder %v1038_v53, 1  ;;  %vm4059_vm3 = vcmp.eq.s32.totalorder %v1039_v1, 1  ;;  %vm4063_vm6 = vcmp.eq.s32.totalorder %v1040_v42, 1  ;;  %vm4067_vm7 = vcmp.eq.s32.totalorder %v1041_v54, 1 }
 0x172   : > { %v4073_v13 = vsel %vm4007_vm8, %v1060_v9, %v1006_v51  ;;  %v4077_v20 = vsel %vm4011_vm10, %v1060_v9, %v1007_v31  ;;  %v4081_v28 = vsel %vm4015_vm12, %v1060_v9, %v1008_v49  ;;  %v4085_v33 = vsel %vm4019_vm9, %v1060_v9, %v1009_v6 }
 0x173   : > { %v4089_v29 = vsel %vm4023_vm13, %v1060_v9, %v1010_v21  ;;  %v4093_v24 = vsel %vm4027_vm5, %v1060_v9, %v1011_v56  ;;  %v4097_v40 = vsel %vm4031_vm1, %v1060_v9, %v1012_v57  ;;  %v4101_v41 = vsel %vm4035_vm0, %v1060_v9, %v1013_v34 }
 0x174   : > { %v4105_v51 = vsel %vm4039_vm15, %v1060_v9, %v1014_v47  ;;  %v4109_v31 = vsel %vm4043_vm14, %v1060_v9, %v1015_v0  ;;  %v4113_v49 = vsel %vm4047_vm11, %v1060_v9, %v1016_v36  ;;  %v4117_v6 = vsel %vm4051_vm4, %v1060_v9, %v1017_v22 }
 0x175   : > { %v4121_v21 = vsel %vm4055_vm2, %v1060_v9, %v1018_v62  ;;  %v4125_v56 = vsel %vm4059_vm3, %v1060_v9, %v1019_v8  ;;  %v4129_v57 = vsel %vm4063_vm6, %v1060_v9, %v1020_v50  ;;  %v4133_v34 = vsel %vm4067_vm7, %v1060_v9, %v1021_v38 }
 0x176   : > { %v1082_v35 = vperm.slane %v4002_v43, 0  ;;  %v1083_v47 = vperm.slane %v4002_v43, 1  ;;  %v1084_v0 = vperm.slane %v4002_v43, 2  ;;  %v1085_v36 = vperm.slane %v4002_v43, 3 }
 0x177   : > { %v1086_v22 = vperm.slane %v4002_v43, 4  ;;  %v1087_v62 = vperm.slane %v4002_v43, 5  ;;  %v1088_v8 = vperm.slane %v4002_v43, 6  ;;  %v1089_v50 = vperm.slane %v4002_v43, 7 }
 0x178   : > { %v1090_v37 = vperm.slane %v4005_v4, 0  ;;  %v1091_v38 = vperm.slane %v4005_v4, 1  ;;  %v1092_v39 = vperm.slane %v4005_v4, 2  ;;  %v1093_v44 = vperm.slane %v4005_v4, 3 }
 0x179   : > { %v1094_v45 = vperm.slane %v4005_v4, 4  ;;  %v1095_v46 = vperm.slane %v4005_v4, 5  ;;  %v1096_v2 = vperm.slane %v4005_v4, 6  ;;  %v1097_v48 = vperm.slane %v4005_v4, 7  ;;  %v4171_v4 = vpop.permute.xlu1 %1115 }
 0x17a   : > { %vm4151_vm8 = vcmp.eq.s32.totalorder %v1082_v35, 1  ;;  %vm4155_vm10 = vcmp.eq.s32.totalorder %v1083_v47, 1  ;;  %vm4159_vm12 = vcmp.eq.s32.totalorder %v1084_v0, 1  ;;  %vm4163_vm9 = vcmp.eq.s32.totalorder %v1085_v36, 1 }
 0x17b   : > { %vm4167_vm13 = vcmp.eq.s32.totalorder %v1086_v22, 1  ;;  %vm4173_vm5 = vcmp.eq.s32.totalorder %v1087_v62, 1  ;;  %vm4177_vm1 = vcmp.eq.s32.totalorder %v1088_v8, 1  ;;  %vm4181_vm0 = vcmp.eq.s32.totalorder %v1089_v50, 1 }
 0x17c   : > { %vm4185_vm15 = vcmp.eq.s32.totalorder %v1090_v37, 1  ;;  %vm4189_vm14 = vcmp.eq.s32.totalorder %v1091_v38, 1  ;;  %vm4193_vm11 = vcmp.eq.s32.totalorder %v1092_v39, 1  ;;  %v5577_v54 = vmov 0  ;;  %v1172_v38 = vpop.permute.xlu2 %1171 }
 0x17d   : > { %v5578_v54 = vsel %vm4193_vm11, 4294967295, %v5577_v54  ;;  %vm4197_vm4 = vcmp.eq.s32.totalorder %v1093_v44, 1  ;;  %vm4201_vm2 = vcmp.eq.s32.totalorder %v1094_v45, 1  ;;  %vm4205_vm3 = vcmp.eq.s32.totalorder %v1095_v46, 1 }
 0x17e   : > { %vm4209_vm6 = vcmp.eq.s32.totalorder %v1096_v2, 1  ;;  %vm4213_vm7 = vcmp.eq.s32.totalorder %v1097_v48, 1  ;;  %vm1134_vm11 = vcmp.eq.s32.totalorder %v3354_v15, 17  ;;  %v1118_v18 = vsel %vm4151_vm8, %v4171_v4, %v4073_v13 }
 0x17f   : > { %v1119_v19 = vsel %vm4155_vm10, %v4171_v4, %v4077_v20  ;;  %v1120_v5 = vsel %vm4159_vm12, %v4171_v4, %v4081_v28  ;;  %v1121_v7 = vsel %vm4163_vm9, %v4171_v4, %v4085_v33  ;;  %v1122_v11 = vsel %vm4167_vm13, %v4171_v4, %v4089_v29 }
 0x180   : > { %v1123_v14 = vsel %vm4173_vm5, %v4171_v4, %v4093_v24  ;;  %v1124_v30 = vsel %vm4177_vm1, %v4171_v4, %v4097_v40  ;;  %vm1135_vm8 = vcmp.eq.s32.totalorder %v3386_v61, 17  ;;  %v1125_v63 = vsel %vm4181_vm0, %v4171_v4, %v4101_v41 }
 0x181   : > { %v1136_v60 = vsel %vm1134_vm11, 1, %v5198_v12  ;;  %vm1190_vm10 = vcmp.eq.s32.totalorder %v3354_v15, 18  ;;  %vm1191_vm12 = vcmp.eq.s32.totalorder %v3386_v61, 18  ;;  %v1126_v27 = vsel %vm4185_vm15, %v4171_v4, %v4105_v51 }
 0x182   : > { %v1127_v25 = vsel %vm4189_vm14, %v4171_v4, %v4109_v31  ;;  %vm5589_vm9 = vnez %v5578_v54  ;;  %v1129_v13 = vsel %vm4197_vm4, %v4171_v4, %v4117_v6  ;;  %v1130_v20 = vsel %vm4201_vm2, %v4171_v4, %v4121_v21 }
 0x183   : > { %v1128_v32 = vsel %vm5589_vm9, %v4171_v4, %v4113_v49  ;;  %v1131_v28 = vsel %vm4205_vm3, %v4171_v4, %v4125_v56  ;;  %v1132_v33 = vsel %vm4209_vm6, %v4171_v4, %v4129_v57  ;;  %v1137_v29 = vsel %vm1135_vm8, 1, %v5198_v12 }
 0x184   : > { %v1133_v24 = vsel %vm4213_vm7, %v4171_v4, %v4133_v34  ;;  %v1138_v40 = vperm.slane %v1136_v60, 0  ;;  %v4288_v41 = vsel %vm1190_vm10, 1, %v5198_v12  ;;  %v4291_v51 = vsel %vm1191_vm12, 1, %v5198_v12 }
 0x185   : > { %v1139_v31 = vperm.slane %v1136_v60, 1  ;;  %v1140_v49 = vperm.slane %v1136_v60, 2  ;;  %v1141_v6 = vperm.slane %v1136_v60, 3  ;;  %v1142_v21 = vperm.slane %v1136_v60, 4 }
 0x186   : > { %v1143_v56 = vperm.slane %v1136_v60, 5  ;;  %v1144_v57 = vperm.slane %v1136_v60, 6  ;;  %v1145_v35 = vperm.slane %v1136_v60, 7  ;;  %v1146_v47 = vperm.slane %v1137_v29, 0 }
 0x187   : > { %v1147_v0 = vperm.slane %v1137_v29, 1  ;;  %v1148_v36 = vperm.slane %v1137_v29, 2  ;;  %v1149_v22 = vperm.slane %v1137_v29, 3  ;;  %v1150_v62 = vperm.slane %v1137_v29, 4 }
 0x188   : > { %v1151_v34 = vperm.slane %v1137_v29, 5  ;;  %v1152_v8 = vperm.slane %v1137_v29, 6  ;;  %v1153_v50 = vperm.slane %v1137_v29, 7  ;;  %vm4293_vm13 = vcmp.eq.s32.totalorder %v1138_v40, 1 }
 0x189   : > { %vm4297_vm5 = vcmp.eq.s32.totalorder %v1139_v31, 1  ;;  %vm4301_vm1 = vcmp.eq.s32.totalorder %v1140_v49, 1  ;;  %vm4305_vm0 = vcmp.eq.s32.totalorder %v1141_v6, 1  ;;  %vm4309_vm15 = vcmp.eq.s32.totalorder %v1142_v21, 1 }
 0x18a   : > { %vm4313_vm14 = vcmp.eq.s32.totalorder %v1143_v56, 1  ;;  %vm4317_vm11 = vcmp.eq.s32.totalorder %v1144_v57, 1  ;;  %vm4321_vm4 = vcmp.eq.s32.totalorder %v1145_v35, 1  ;;  %vm4325_vm2 = vcmp.eq.s32.totalorder %v1146_v47, 1 }
 0x18b   : > { %vm4329_vm3 = vcmp.eq.s32.totalorder %v1147_v0, 1  ;;  %vm4333_vm6 = vcmp.eq.s32.totalorder %v1148_v36, 1  ;;  %vm4337_vm7 = vcmp.eq.s32.totalorder %v1149_v22, 1  ;;  %vm4341_vm8 = vcmp.eq.s32.totalorder %v1150_v62, 1 }
 0x18c   : > { %vm4345_vm10 = vcmp.eq.s32.totalorder %v1151_v34, 1  ;;  %vm4349_vm12 = vcmp.eq.s32.totalorder %v1152_v8, 1  ;;  %vm4353_vm9 = vcmp.eq.s32.totalorder %v1153_v50, 1  ;;  %v4359_v1 = vsel %vm4293_vm13, %v1172_v38, %v1118_v18 }
 0x18d   : > { %v4363_v42 = vsel %vm4297_vm5, %v1172_v38, %v1119_v19  ;;  %v4367_v54 = vsel %vm4301_vm1, %v1172_v38, %v1120_v5  ;;  %v4371_v55 = vsel %vm4305_vm0, %v1172_v38, %v1121_v7  ;;  %v4375_v9 = vsel %vm4309_vm15, %v1172_v38, %v1122_v11 }
 0x18e   : > { %v4379_v10 = vsel %vm4313_vm14, %v1172_v38, %v1123_v14  ;;  %v4383_v16 = vsel %vm4317_vm11, %v1172_v38, %v1124_v30  ;;  %v4387_v17 = vsel %vm4321_vm4, %v1172_v38, %v1125_v63  ;;  %v4391_v18 = vsel %vm4325_vm2, %v1172_v38, %v1126_v27 }
 0x18f   : > { %v4395_v19 = vsel %vm4329_vm3, %v1172_v38, %v1127_v25  ;;  %v4399_v5 = vsel %vm4333_vm6, %v1172_v38, %v1128_v32  ;;  %v4403_v7 = vsel %vm4337_vm7, %v1172_v38, %v1129_v13  ;;  %v4407_v11 = vsel %vm4341_vm8, %v1172_v38, %v1130_v20 }
 0x190   : > { %v4411_v14 = vsel %vm4345_vm10, %v1172_v38, %v1131_v28  ;;  %v4415_v30 = vsel %vm4349_vm12, %v1172_v38, %v1132_v33  ;;  %v4419_v63 = vsel %vm4353_vm9, %v1172_v38, %v1133_v24  ;;  %v1194_v60 = vperm.slane %v4288_v41, 0 }
 0x191   : > { %v1195_v27 = vperm.slane %v4288_v41, 1  ;;  %v1196_v25 = vperm.slane %v4288_v41, 2  ;;  %v1197_v32 = vperm.slane %v4288_v41, 3  ;;  %v1198_v13 = vperm.slane %v4288_v41, 4 }
 0x192   : > { %v1199_v20 = vperm.slane %v4288_v41, 5  ;;  %v1200_v28 = vperm.slane %v4288_v41, 6  ;;  %v1201_v33 = vperm.slane %v4288_v41, 7  ;;  %v1202_v29 = vperm.slane %v4291_v51, 0  ;;  %v4441_v41 = vpop.permute.xlu0 %1227 }
 0x193   : > { %v1203_v24 = vperm.slane %v4291_v51, 1  ;;  %v1204_v40 = vperm.slane %v4291_v51, 2  ;;  %v1205_v31 = vperm.slane %v4291_v51, 3  ;;  %v1206_v49 = vperm.slane %v4291_v51, 4 }
 0x194   : > { %v1207_v6 = vperm.slane %v4291_v51, 5  ;;  %v1208_v21 = vperm.slane %v4291_v51, 6  ;;  %v1209_v56 = vperm.slane %v4291_v51, 7  ;;  %vm4437_vm13 = vcmp.eq.s32.totalorder %v1194_v60, 1 }
 0x195   : > { %vm4443_vm5 = vcmp.eq.s32.totalorder %v1195_v27, 1  ;;  %vm4447_vm1 = vcmp.eq.s32.totalorder %v1196_v25, 1  ;;  %vm4451_vm0 = vcmp.eq.s32.totalorder %v1197_v32, 1  ;;  %vm4455_vm15 = vcmp.eq.s32.totalorder %v1198_v13, 1 }
 0x196   : > { %vm4459_vm14 = vcmp.eq.s32.totalorder %v1199_v20, 1  ;;  %vm4463_vm11 = vcmp.eq.s32.totalorder %v1200_v28, 1  ;;  %vm4467_vm4 = vcmp.eq.s32.totalorder %v1201_v33, 1  ;;  %v5636_v34 = vmov 0 }
 0x197   : > { %v5637_v34 = vsel %vm4467_vm4, 4294967295, %v5636_v34  ;;  %vm4471_vm2 = vcmp.eq.s32.totalorder %v1202_v29, 1  ;;  %v5638_v8 = vmov 0  ;;  %vm4475_vm3 = vcmp.eq.s32.totalorder %v1203_v24, 1 }
 0x198   : > { %v5639_v8 = vsel %vm4471_vm2, 4294967295, %v5638_v8  ;;  %v5640_v50 = vmov 0  ;;  %vm4479_vm6 = vcmp.eq.s32.totalorder %v1204_v40, 1  ;;  %v5642_v37 = vmov 0 }
 0x199   : > { %v5641_v50 = vsel %vm4475_vm3, 4294967295, %v5640_v50  ;;  %v5643_v37 = vsel %vm4479_vm6, 4294967295, %v5642_v37  ;;  %vm4483_vm7 = vcmp.eq.s32.totalorder %v1205_v31, 1  ;;  %v5644_v38 = vmov 0 }
 0x19a   : > { %v5645_v38 = vsel %vm4483_vm7, 4294967295, %v5644_v38  ;;  %vm1246_vm8 = vcmp.eq.s32.totalorder %v3354_v15, 19  ;;  %vm4488_vm10 = vcmp.eq.s32.totalorder %v1206_v49, 1  ;;  %v5646_v39 = vmov 0 }
 0x19b   : > { %v5647_v39 = vsel %vm4488_vm10, 4294967295, %v5646_v39  ;;  %vm4492_vm12 = vcmp.eq.s32.totalorder %v1207_v6, 1  ;;  %v5648_v44 = vmov 0  ;;  %v1230_v45 = vsel %vm4437_vm13, %v4441_v41, %v4359_v1 }
 0x19c   : > { %v5649_v44 = vsel %vm4492_vm12, 4294967295, %v5648_v44  ;;  %v1231_v46 = vsel %vm4443_vm5, %v4441_v41, %v4363_v42  ;;  %v1232_v2 = vsel %vm4447_vm1, %v4441_v41, %v4367_v54  ;;  %v1233_v48 = vsel %vm4451_vm0, %v4441_v41, %v4371_v55 }
 0x19d   : > { %v1234_v58 = vsel %vm4455_vm15, %v4441_v41, %v4375_v9  ;;  %vm1247_vm9 = vcmp.eq.s32.totalorder %v3386_v61, 19  ;;  %v1235_v43 = vsel %vm4459_vm14, %v4441_v41, %v4379_v10  ;;  %v1248_v3 = vsel %vm1246_vm8, 1, %v5198_v12 }
 0x19e   : > { %vm1302_vm13 = vcmp.eq.s32.totalorder %v3354_v15, 20  ;;  %vm1303_vm5 = vcmp.eq.s32.totalorder %v3386_v61, 20  ;;  %v4553_v53 = vsel %vm1247_vm9, 1, %v5198_v12  ;;  %v1250_v42 = vperm.slane %v1248_v3, 0 }
 0x19f   : > { %v4560_v54 = vsel %vm1302_vm13, 1, %v5198_v12  ;;  %v4563_v60 = vsel %vm1303_vm5, 1, %v5198_v12  ;;  %v1251_v27 = vperm.slane %v1248_v3, 1  ;;  %v1252_v25 = vperm.slane %v1248_v3, 2 }
 0x1a0   : > { %v1253_v32 = vperm.slane %v1248_v3, 3  ;;  %v1254_v13 = vperm.slane %v1248_v3, 4  ;;  %v1255_v20 = vperm.slane %v1248_v3, 5  ;;  %v1256_v28 = vperm.slane %v1248_v3, 6 }
 0x1a1   : > { %v1257_v33 = vperm.slane %v1248_v3, 7  ;;  %v1258_v29 = vperm.slane %v4553_v53, 0  ;;  %v1259_v24 = vperm.slane %v4553_v53, 1  ;;  %v1260_v40 = vperm.slane %v4553_v53, 2 }
 0x1a2   : > { %v1261_v31 = vperm.slane %v4553_v53, 3  ;;  %v1262_v49 = vperm.slane %v4553_v53, 4  ;;  %v1263_v12 = vperm.slane %v4553_v53, 5  ;;  %v1264_v6 = vperm.slane %v4553_v53, 6 }
 0x1a3   : > { %vm4573_vm1 = vcmp.eq.s32.totalorder %v1250_v42, 1  ;;  %vm4577_vm8 = vcmp.eq.s32.totalorder %v1251_v27, 1  ;;  %vm4581_vm9 = vcmp.eq.s32.totalorder %v1252_v25, 1  ;;  %vm4585_vm13 = vcmp.eq.s32.totalorder %v1253_v32, 1  ;;  %v4593_v42 = vpop.permute.xlu1 %1283 }
 0x1a4   : > { %vm4589_vm5 = vcmp.eq.s32.totalorder %v1254_v13, 1  ;;  %vm4595_vm12 = vcmp.eq.s32.totalorder %v1255_v20, 1  ;;  %v1306_v57 = vperm.slane %v4560_v54, 0  ;;  %v1307_v25 = vperm.slane %v4560_v54, 1 }
 0x1a5   : > { %v1308_v26 = vperm.slane %v4560_v54, 2  ;;  %vm4602_vm10 = vcmp.eq.s32.totalorder %v1256_v28, 1  ;;  %vm4606_vm7 = vcmp.eq.s32.totalorder %v1257_v33, 1  ;;  %v5664_v13 = vmov 0 }
 0x1a6   : > { %v5665_v13 = vsel %vm4606_vm7, 4294967295, %v5664_v13  ;;  %vm4610_vm6 = vcmp.eq.s32.totalorder %v1258_v29, 1  ;;  %v1309_v20 = vperm.slane %v4560_v54, 3  ;;  %vm4615_vm3 = vcmp.eq.s32.totalorder %v1259_v24, 1 }
 0x1a7   : > { %vm4619_vm2 = vcmp.eq.s32.totalorder %v1260_v40, 1  ;;  %vm4623_vm4 = vcmp.eq.s32.totalorder %v1261_v31, 1  ;;  %v5672_v28 = vmov 0  ;;  %v1310_v33 = vperm.slane %v4560_v54, 4 }
 0x1a8   : > { %v5673_v28 = vsel %vm4623_vm4, 4294967295, %v5672_v28  ;;  %vm4629_vm7 = vcmp.eq.s32.totalorder %v1262_v49, 1  ;;  %v5674_v29 = vmov 0  ;;  %v1286_v24 = vsel %vm4573_vm1, %v4593_v42, %v1230_v45  ;;  %v4653_v45 = vpop.permute.xlu2 %1339 }
 0x1a9   : > { %v5675_v29 = vsel %vm4629_vm7, 4294967295, %v5674_v29  ;;  %v1287_v40 = vsel %vm4577_vm8, %v4593_v42, %v1231_v46  ;;  %v1288_v31 = vsel %vm4581_vm9, %v4593_v42, %v1232_v2  ;;  %v1311_v59 = vperm.slane %v4560_v54, 5 }
 0x1aa   : > { %vm4645_vm4 = vcmp.eq.s32.totalorder %v1208_v21, 1  ;;  %v5676_v49 = vmov 0  ;;  %vm4649_vm7 = vcmp.eq.s32.totalorder %v1263_v12, 1  ;;  %v5678_v23 = vmov 0 }
 0x1ab   : > { %v5677_v49 = vsel %vm4645_vm4, 4294967295, %v5676_v49  ;;  %v5679_v23 = vsel %vm4649_vm7, 4294967295, %v5678_v23  ;;  %v1312_v46 = vperm.slane %v4560_v54, 6  ;;  %vm4656_vm1 = vcmp.eq.s32.totalorder %v1306_v57, 1 }
 0x1ac   : > { %vm4660_vm8 = vcmp.eq.s32.totalorder %v1307_v25, 1  ;;  %vm4664_vm9 = vcmp.eq.s32.totalorder %v1308_v26, 1  ;;  %vm4670_vm4 = vcmp.eq.s32.totalorder %v1209_v56, 1  ;;  %vm4674_vm7 = vcmp.eq.s32.totalorder %v1264_v6, 1 }
 0x1ad   : > { %v5688_v47 = vmov 0  ;;  %v1289_v26 = vsel %vm4585_vm13, %v4593_v42, %v1233_v48  ;;  %v1290_v51 = vsel %vm4589_vm5, %v4593_v42, %v1234_v58  ;;  %v1313_v56 = vperm.slane %v4560_v54, 7 }
 0x1ae   : > { %v5689_v47 = vsel %vm4674_vm7, 4294967295, %v5688_v47  ;;  %vm4695_vm7 = vcmp.eq.s32.totalorder %v1309_v20, 1  ;;  %v1291_v55 = vsel %vm4595_vm12, %v4593_v42, %v1235_v43  ;;  %v1314_v9 = vperm.slane %v4563_v60, 0 }
 0x1af   : > { %v1315_v36 = vperm.slane %v4563_v60, 1  ;;  %vm4709_vm0 = vcmp.eq.s32.totalorder %v1310_v33, 1  ;;  %vm4713_vm15 = vcmp.eq.s32.totalorder %v1311_v59, 1  ;;  %v1342_v10 = vsel %vm4656_vm1, %v4653_v45, %v1286_v24 }
 0x1b0   : > { %v1343_v22 = vsel %vm4660_vm8, %v4653_v45, %v1287_v40  ;;  %v1344_v43 = vsel %vm4664_vm9, %v4653_v45, %v1288_v31  ;;  %v5696_v59 = vsel %vm4463_vm11, %v4441_v41, %v4383_v16  ;;  %v1316_v1 = vperm.slane %v4563_v60, 2  ;;  %1358 = vst [vmem:[%s4744_s20] sm:$0x7f] %v1342_v10 }
 0x1b1   : > { %v1292_v52 = vsel %vm4602_vm10, %v4593_v42, %v5696_v59  ;;  %vm4735_vm14 = vcmp.eq.s32.totalorder %v1312_v46, 1  ;;  %v1345_v6 = vsel %vm4695_vm7, %v4653_v45, %v1289_v26  ;;  %vm5699_vm11 = vnez %v5637_v34  ;;  %1359 = vst [vmem:[%s4744_s20 + $0x8] sm:$0x7f] %v1343_v22 }
 0x1b2   : > { %v5700_v16 = vsel %vm5699_vm11, %v4441_v41, %v4387_v17  ;;  %vm5701_vm10 = vnez %v5665_v13  ;;  %v1317_v57 = vperm.slane %v4563_v60, 3  ;;  %vm4756_vm7 = vcmp.eq.s32.totalorder %v1313_v56, 1  ;;  %1360 = vst [vmem:[%s4744_s20 + $0x10] sm:$0x7f] %v1344_v43 }
 0x1b3   : > { %v1293_v62 = vsel %vm5701_vm10, %v4593_v42, %v5700_v16  ;;  %v1346_v27 = vsel %vm4709_vm0, %v4653_v45, %v1290_v51  ;;  %vm5704_vm12 = vnez %v5639_v8  ;;  %v1318_v25 = vperm.slane %v4563_v60, 4  ;;  %1361 = vst [vmem:[%s4744_s20 + $0x18] sm:$0x7f] %v1345_v6 }
 0x1b4   : > { %v5705_v17 = vsel %vm5704_vm12, %v4441_v41, %v4391_v18  ;;  %vm4773_vm13 = vcmp.eq.s32.totalorder %v1314_v9, 1  ;;  %v1347_v13 = vsel %vm4713_vm15, %v4653_v45, %v1291_v55  ;;  %vm5708_vm5 = vnez %v5641_v50  ;;  %1362 = vst [vmem:[%s4744_s20 + $0x20] sm:$0x7f] %v1346_v27 }
 0x1b5   : > { %v1294_v34 = vsel %vm4610_vm6, %v4593_v42, %v5705_v17  ;;  %v5709_v18 = vsel %vm5708_vm5, %v4441_v41, %v4395_v19  ;;  %v1319_v61 = vperm.slane %v4563_v60, 5  ;;  %vm4790_vm6 = vcmp.eq.s32.totalorder %v1315_v36, 1  ;;  %1363 = vst [vmem:[%s4744_s20 + $0x28] sm:$0x7f] %v1347_v13 }
 0x1b6   : > { %v1295_v8 = vsel %vm4615_vm3, %v4593_v42, %v5709_v18  ;;  %v1348_v33 = vsel %vm4735_vm14, %v4653_v45, %v1292_v52  ;;  %vm5712_vm1 = vnez %v5643_v37  ;;  %v1320_v15 = vperm.slane %v4563_v60, 6 }
 0x1b7   : > { %v5713_v19 = vsel %vm5712_vm1, %v4441_v41, %v4399_v5  ;;  %vm4807_vm3 = vcmp.eq.s32.totalorder %v1316_v1, 1  ;;  %v1349_v40 = vsel %vm4756_vm7, %v4653_v45, %v1293_v62  ;;  %vm5716_vm8 = vnez %v5645_v38  ;;  %1364 = vst [vmem:[%s4744_s20 + $0x30] sm:$0x7f] %v1348_v33 }
 0x1b8   : > { %v1296_v50 = vsel %vm4619_vm2, %v4593_v42, %v5713_v19  ;;  %v5717_v5 = vsel %vm5716_vm8, %v4441_v41, %v4403_v7  ;;  %vm5718_vm2 = vnez %v5673_v28  ;;  %v1321_v4 = vperm.slane %v4563_v60, 7  ;;  %1365 = vst [vmem:[%s4744_s20 + $0x38] sm:$0x7f] %v1349_v40 }
 0x1b9   : > { %v1297_v37 = vsel %vm5718_vm2, %v4593_v42, %v5717_v5  ;;  %vm4825_vm9 = vcmp.eq.s32.totalorder %v1317_v57, 1  ;;  %v1350_v46 = vsel %vm4773_vm13, %v4653_v45, %v1294_v34  ;;  %v5721_v38 = vperm.slane %v4553_v53, 7 }
 0x1ba   : > { %vm5724_vm15 = vnez %v5647_v39  ;;  %vm5726_vm14 = vnez %v5675_v29  ;;  %vm4847_vm11 = vcmp.eq.s32.totalorder %v1318_v25, 1  ;;  %v1351_v53 = vsel %vm4790_vm6, %v4653_v45, %v1295_v8  ;;  %1366 = vst [vmem:[%s4744_s20 + $0x40] sm:$0x7f] %v1350_v46 }
 0x1bb   : > { %vm4835_vm0 = vcmp.eq.s32.totalorder %v5721_v38, 1  ;;  %v5725_v60 = vsel %vm5724_vm15, %v4441_v41, %v4407_v11  ;;  %vm5729_vm10 = vnez %v5677_v49  ;;  %vm5730_vm7 = vnez %v5649_v44  ;;  %1367 = vst [vmem:[%s4744_s20 + $0x48] sm:$0x7f] %v1351_v53 }
 0x1bc   : > { %v1298_v28 = vsel %vm5726_vm14, %v4593_v42, %v5725_v60  ;;  %v1244_v39 = vsel %vm5729_vm10, %v4441_v41, %v4415_v30  ;;  %v5731_v11 = vsel %vm5730_vm7, %v4441_v41, %v4411_v14  ;;  %vm5732_vm12 = vnez %v5679_v23 }
 0x1bd   : > { %v1299_v29 = vsel %vm5732_vm12, %v4593_v42, %v5731_v11  ;;  %vm4867_vm13 = vcmp.eq.s32.totalorder %v1319_v61, 1  ;;  %v1352_v49 = vsel %vm4807_vm3, %v4653_v45, %v1296_v50  ;;  %v1245_v14 = vsel %vm4670_vm4, %v4441_v41, %v4419_v63 }
 0x1be   : > { %vm5735_vm5 = vnez %v5689_v47  ;;  %vm4885_vm6 = vcmp.eq.s32.totalorder %v1320_v15, 1  ;;  %v1353_v23 = vsel %vm4825_vm9, %v4653_v45, %v1297_v37  ;;  %v1301_v63 = vsel %vm4835_vm0, %v4593_v42, %v1245_v14  ;;  %1368 = vst [vmem:[%s4744_s20 + $0x50] sm:$0x7f] %v1352_v49 }
 0x1bf   : > { %v1300_v30 = vsel %vm5735_vm5, %v4593_v42, %v1244_v39  ;;  %vm1337_vm4 = vcmp.eq.s32.totalorder %v1321_v4, 1  ;;  %v1354_v41 = vsel %vm4847_vm11, %v4653_v45, %v1298_v28  ;;  %v1355_v21 = vsel %vm4867_vm13, %v4653_v45, %v1299_v29  ;;  %1369 = vst [vmem:[%s4744_s20 + $0x58] sm:$0x7f] %v1353_v23 }
 0x1c0   : > { %v1356_v42 = vsel %vm4885_vm6, %v4653_v45, %v1300_v30  ;;  %v1357_v12 = vsel %vm1337_vm4, %v4653_v45, %v1301_v63  ;;  %1370 = vst [vmem:[%s4744_s20 + $0x60] sm:$0x7f] %v1354_v41 }
 0x1c1   : > { %1371 = vst [vmem:[%s4744_s20 + $0x68] sm:$0x7f] %v1355_v21 }
 0x1c2   : > { %1372 = vst [vmem:[%s4744_s20 + $0x70] sm:$0x7f] %v1356_v42 }
 0x1c3   : > { %1373 = vst [vmem:[%s4744_s20 + $0x78] sm:$0x7f] %v1357_v12 }
 0x1c4   : > { %1676 = shalt.err (!%p1673_p10)
}
 0x1c5   : > { %1493 = dma.vmem_to_hbm [thread:$0]  (%p1823_p0), %s1389_s8, 2048, %s1391_s14, %s1375_s17  }
 0x1c6 PF: > { %p1510_p11 = scmp.ge.s32.totalorder %s1719_s12, 2  ;;  %s1402_s28 = sand.u32 1, %s1707_s9  }
 0x1c7   : > { %s1403_s30 = scalar_lea.sflag [#allocation4], %s1402_s28 }
 0x1c8   : > { %p1504_p12 = pnand %p1510_p11, %p1793_p6 }
 0x1ca   : > { %p1505_p13 = pneg %p1504_p12 }
 0x1cc   : > { %1702 = dma.done.wait (%p1505_p13), %s1403_s30, 2048  }
 0x1cd   : > { %1704 = vsyncadd (%p1505_p13), %s1403_s30, 4294965248  ;;  %p16_p3 = scmp.ge.s32.totalorder %s1810_s23, 6   ;;  %s5738_s9 = smov %s1711_s10 }
 0x1ce   : > { %s5739_s10 = smov %s1715_s11  ;;  %s5740_s11 = smov %s1819_s26 }
 0x1cf   : > { %s5741_s12 = smov %s1810_s23  ;;  %18 = sbr.rel (!%p16_p3) target bundleno = 6 (0x6), region = 77 }
 0x1d4   :  { %1409 = vsyncpa [#allocation3], 1 }
 0x1d5   :  { %1411 = vsyncpa [#allocation3 + $0x1], 1 }
 0x1d6   :  { %1412 = vsyncpa [#allocation6], 1 }
 0x1d7   :  { %1413 = vsyncpa [#allocation4], 1 }
 0x1d8   :  { %1415 = vsyncpa [#allocation4 + $0x1], 1 }

</bundles_post_ra>
